<compile_context>
chip_gen: v7x
topology: tpu7x:2x2x1
jax: 0.10.0
libtpu: 0.0.40
codegen_flags: <defaults>
</compile_context>

<pallas_src>
from typing import NamedTuple

import jax
import jax.numpy as jnp
from jax.experimental import pallas as pl
from jax.experimental.pallas import tpu as pltpu


# Conservative scratch budget: v5e default scoped VMEM is 16 MiB, v7x physical
# VMEM is 64 MiB (32 MiB default scoped) -> stay comfortably under all of them.
_VMEM_BUDGET_BYTES = 12 * 2**20


def _leaky_relu(x, slope=0.2):
    return jnp.where(x > 0, x, slope * x)


def _round_up(x, m):
    return (x + m - 1) // m * m


def _vmem_bytes_estimate(tb, tk, h1p, h2p, x_itemsize=4):
    """Rough VMEM footprint of the pallas_call buffers (double-buffered inputs)."""
    x_buf = 2 * tb * tk * x_itemsize          # pipelined x tile
    w1_buf = 2 * tk * h1p * 2                 # bf16 w1 tile (conservative: x2)
    w2_buf = 2 * h1p * h2p * 2                # bf16 w2 (resident)
    small = 2 * (h1p + h2p) * 4 + 2 * h2p * 2 + 256   # b1, b2 (f32), w3 (bf16)
    acc = tb * h1p * 4                        # layer-1 f32 accumulator scratch
    out = 2 * 8 * tb * 4                      # (1, tb) f32 output block (sublane-padded)
    return x_buf + w1_buf + w2_buf + small + acc + out


class Plan(NamedTuple):
    """Static tiling plan (hashable -> usable as a jit static argument)."""
    n_features: int
    h1p: int
    h2p: int
    f_pad: int          # feature extent seen by the kernel (= n_features unless K-tiled)
    k_tile: int         # layer-1 feature (K) tile
    max_batch_tile: int


def prepare_params(params, *, max_batch_tile=512, vmem_budget=_VMEM_BUDGET_BYTES):
    """One-time weight prep: pad hidden dims to lane multiples, cast to bf16.

    Do this ONCE and reuse the result across forward calls (it is deliberately
    kept out of the jitted per-call path).  params: w1 (F,H1), b1 (1,H1),
    w2 (H1,H2), b2 (1,H2), w3 (H2,1), b3 (1,1) -- oriented so layer = x @ w + b.
    """
    w1, b1 = params["w1"], params["b1"]
    w2, b2 = params["w2"], params["b2"]
    w3, b3 = params["w3"], params["b3"]
    F, H1 = w1.shape
    H2 = w2.shape[1]
    H1p, H2p = _round_up(H1, 128), _round_up(H2, 128)

    # ---- feature (K) tiling plan for layer 1: VMEM guard (matters on v7x). ----
    if _vmem_bytes_estimate(max_batch_tile, F, H1p, H2p) <= vmem_budget:
        k_tile, f_pad = F, F                  # single K step: no F padding, no masking
    else:
        k_tile = 512
        while (k_tile + 512 < F and
               _vmem_bytes_estimate(max_batch_tile, k_tile + 512, H1p, H2p) <= vmem_budget):
            k_tile += 512
        f_pad = _round_up(F, k_tile)

    prepped = dict(
        w1=jnp.pad(w1.astype(jnp.bfloat16), ((0, f_pad - F), (0, H1p - H1))),
        b1=jnp.pad(b1.reshape(1, H1).astype(jnp.float32), ((0, 0), (0, H1p - H1))),
        w2=jnp.pad(w2.astype(jnp.bfloat16), ((0, H1 - H1 + 0), (0, 0)))  # placeholder, replaced below
    )
    # (build w2/b2/w3 explicitly; zero padding is mathematically exact)
    prepped["w2"] = jnp.pad(w2.astype(jnp.bfloat16), ((0, H1p - H1), (0, H2p - H2)))
    prepped["b2"] = jnp.pad(b2.reshape(1, H2).astype(jnp.float32), ((0, 0), (0, H2p - H2)))
    prepped["w3"] = jnp.pad(w3.reshape(1, H2).astype(jnp.bfloat16), ((0, 0), (0, H2p - H2)))
    prepped["b3"] = b3.reshape(1, 1).astype(jnp.float32)

    plan = Plan(n_features=F, h1p=H1p, h2p=H2p, f_pad=f_pad, k_tile=k_tile,
                max_batch_tile=max_batch_tile)
    return prepped, plan


def _pick_batch_tile(B, requested, max_tile):
    if requested is not None:
        # Clamp/validate: the (tb, k) input and (1, tb) output blocks need a
        # multiple of 128 for unmasked, lane-dense stores.
        return max(128, _round_up(int(requested), 128))
    if B <= 128:
        return 128
    # Larger tiles amortize the ~0.35us/step overhead; keep >= 2 grid steps so
    # both v7x TensorCores get a share of the batch.
    return min(max_tile, _round_up(-(-B // 2), 128))


def _make_kernel(n_features, k_tile, mask_tail, slope=0.2):
    def kernel(x_ref, w1_ref, b1_ref, w2_ref, b2_ref, w3_ref, b3_ref, o_ref, acc_ref):
        # x : (tb, k_tile) input dtype    w1: (k_tile, H1p) bf16   b1: (1, H1p) f32
        #                                 w2: (H1p,  H2p)  bf16    b2: (1, H2p) f32
        #                                 w3: (1,    H2p)  bf16    b3: (1, 1)   f32 (SMEM)
        # o : (1, tb) f32  (batch on the lane axis -> dense stores)
        k = pl.program_id(1)

        @pl.when(k == 0)
        def _init():
            acc_ref[...] = jnp.zeros_like(acc_ref)

        x = x_ref[...]
        if mask_tail:
            # Last K block reads past the end of the feature dim: zero the tail
            # so (possibly non-finite) out-of-bounds garbage never reaches acc.
            col = k * k_tile + jax.lax.broadcasted_iota(jnp.int32, x.shape, 1)
            x = jnp.where(col < n_features, x, 0)
        # bf16 cast happens here in VMEM (no materialized HBM copy of x).
        acc_ref[...] += jnp.dot(x.astype(jnp.bfloat16), w1_ref[...],
                                preferred_element_type=jnp.float32)

        @pl.when(k == pl.num_programs(1) - 1)
        def _finish():
            h1 = _leaky_relu(acc_ref[...] + b1_ref[...], slope).astype(jnp.bfloat16)
            h2 = jnp.dot(h1, w2_ref[...], preferred_element_type=jnp.float32) + b2_ref[...]
            h2 = _leaky_relu(h2, slope).astype(jnp.bfloat16)
            # Final layer: (1, H2p) . (tb, H2p)^T -> (1, tb); result is already
            # lane-dense.  (Only revisit on v5e if the dump shows an un-hidden
            # vxpose on the critical path.)
            y = jax.lax.dot_general(
                w3_ref[...], h2,
                dimension_numbers=(((1,), (1,)), ((), ())),
                preferred_element_type=jnp.float32,
            )
            o_ref[...] = y + b3_ref[0, 0]

    return kernel


def discriminator_syn2d(img, prepped, plan, *, batch_tile=None):
    """Forward pass.  `prepped`/`plan` come from prepare_params (call it once).

    img: (B, C, H, W).  Accepts f32 or (preferably, for half the HBM traffic)
    bf16 activations; no padded/cast copy of x is materialized in HBM.
    """
    B = img.shape[0]
    x = img.reshape(B, -1)                       # matches torch img.view(B, -1)
    if x.shape[1] != plan.n_features:
        raise ValueError(f"expected {plan.n_features} features, got {x.shape[1]}")

    tb = _pick_batch_tile(B, batch_tile, plan.max_batch_tile)
    grid_b = pl.cdiv(B, tb)
    grid_k = plan.f_pad // plan.k_tile
    mask_tail = plan.f_pad > plan.n_features     # ragged feature tail (K-tiled case)

    kernel = _make_kernel(plan.n_features, plan.k_tile, mask_tail)

    # Constant-index blocks never change across the grid: drop their double
    # buffers (pl.Buffered(1)) once the waste is material (large F / hidden).
    const_bytes = prepped["w2"].size * 2 + (prepped["w1"].size * 2 if grid_k == 1 else 0)
    single_buffer = const_bytes > (2 << 20)

    def const_spec(shape):
        if single_buffer:
            return pl.BlockSpec(shape, lambda i, k: (0, 0), pipeline_mode=pl.Buffered(1))
        return pl.BlockSpec(shape, lambda i, k: (0, 0))

    if grid_k == 1:
        w1_spec = const_spec((plan.k_tile, plan.h1p))                    # resident
    else:
        w1_spec = pl.BlockSpec((plan.k_tile, plan.h1p), lambda i, k: (k, 0))  # pipelined

    est = _vmem_bytes_estimate(tb, plan.k_tile, plan.h1p, plan.h2p, x.dtype.itemsize)
    cp_kwargs = dict(dimension_semantics=("parallel", "arbitrary"))
    if est > _VMEM_BUDGET_BYTES:
        # Planner could not get under the conservative budget (e.g. huge hidden
        # dims): raise the scoped-VMEM limit, staying under v7x's 64 MiB physical.
        cp_kwargs["vmem_limit_bytes"] = min(int(est * 5 // 4), 56 * 2**20)

    out = pl.pallas_call(
        kernel,
        out_shape=jax.ShapeDtypeStruct((1, B), jnp.float32),      # unpadded batch
        grid=(grid_b, grid_k),                                    # reduction axis last
        in_specs=[
            pl.BlockSpec((tb, plan.k_tile), lambda i, k: (i, k)),  # x: auto-pipelined
            w1_spec,
            const_spec((1, plan.h1p)),                             # b1
            const_spec((plan.h1p, plan.h2p)),                      # w2 (resident)
            const_spec((1, plan.h2p)),                             # b2
            const_spec((1, plan.h2p)),                             # w3 (row form)
            pl.BlockSpec(memory_space=pltpu.MemorySpace.SMEM),     # b3 scalar
        ],
        out_specs=pl.BlockSpec((1, tb), lambda i, k: (0, i)),      # lane-dense slab
        scratch_shapes=[pltpu.VMEM((tb, plan.h1p), jnp.float32)],  # layer-1 f32 acc
        compiler_params=pltpu.CompilerParams(**cp_kwargs),
    )(x, prepped["w1"], prepped["b1"], prepped["w2"], prepped["b2"],
      prepped["w3"], prepped["b3"])

    return out.reshape(B, 1)


def init_params(key, n_features, d_hid_list):
    """Deterministic init mimicking nn.Linear default: U(-1/sqrt(fan_in), +)."""
    k1, k2, k3, k4, k5, k6 = jax.random.split(key, 6)
    h1, h2 = d_hid_list

    def lin(kw, kb, fan_in, fan_out):
        bound = 1.0 / jnp.sqrt(fan_in)
        w = jax.random.uniform(kw, (fan_in, fan_out), jnp.float32, -bound, bound)
        b = jax.random.uniform(kb, (1, fan_out), jnp.float32, -bound, bound)
        return w, b

    w1, b1 = lin(k1, k2, n_features, h1)
    w2, b2 = lin(k3, k4, h1, h2)
    w3, b3 = lin(k5, k6, h2, 1)
    return dict(w1=w1, b1=b1, w2=w2, b2=b2, w3=w3, b3=b3)


def reference_f32(img, params):
    x = img.reshape(img.shape[0], -1)
    x = _leaky_relu(x @ params["w1"] + params["b1"])
    x = _leaky_relu(x @ params["w2"] + params["b2"])
    return x @ params["w3"] + params["b3"]


def reference_bf16(img, params):
    """Emulates the kernel numerics: bf16 storage/operands, f32 accumulation."""
    x = img.reshape(img.shape[0], -1).astype(jnp.bfloat16)
    w1 = params["w1"].astype(jnp.bfloat16)
    w2 = params["w2"].astype(jnp.bfloat16)
    w3 = params["w3"].astype(jnp.bfloat16)
    h1 = jnp.dot(x, w1, preferred_element_type=jnp.float32) + params["b1"]
    h1 = _leaky_relu(h1).astype(jnp.bfloat16)
    h2 = jnp.dot(h1, w2, preferred_element_type=jnp.float32) + params["b2"]
    h2 = _leaky_relu(h2).astype(jnp.bfloat16)
    return jnp.dot(h2, w3, preferred_element_type=jnp.float32) + params["b3"]


if __name__ == "__main__":
    key = jax.random.PRNGKey(0)
    k_img, k_par = jax.random.split(key)

    B, C, H, W = 2, 4, 16, 16
    n_features = C * H * W          # 1024
    d_hid_list = [128, 64]

    img = jax.random.normal(k_img, (B, C, H, W), jnp.float32)
    params = init_params(k_par, n_features, d_hid_list)

    # One-time weight prep (pad + bf16 cast) is kept OUT of the per-call path.
    prepped, plan = prepare_params(params)

    fwd = jax.jit(discriminator_syn2d, static_argnums=2)   # plan is static
    out = jax.block_until_ready(fwd(img, prepped, plan))

    assert out.shape == (B, 1), out.shape

    # Tight check against a bf16-emulating reference (same numerics as the kernel).
    ref_b = reference_bf16(img, params)
    assert jnp.allclose(out, ref_b, atol=2e-3, rtol=2e-3), (out, ref_b)

    # Loose check against the full-f32 PyTorch-equivalent reference.
    ref_f = reference_f32(img, params)
    assert jnp.allclose(out, ref_f, atol=5e-2, rtol=5e-2), (out, ref_f)

    print("KERNEL_OK")
</pallas_src>

<mosaic_0001>
module attributes {stable_mosaic.version = 11 : i64} {
  func.func @kernel(%arg0: i32, %arg1: i32, %arg2: memref<128x1024xf32, #tpu.memory_space<vmem>>, %arg3: memref<1024x128xbf16, #tpu.memory_space<vmem>>, %arg4: memref<1x128xf32, #tpu.memory_space<vmem>>, %arg5: memref<128x128xbf16, #tpu.memory_space<vmem>>, %arg6: memref<1x128xf32, #tpu.memory_space<vmem>>, %arg7: memref<1x128xbf16, #tpu.memory_space<vmem>>, %arg8: memref<1x1xf32, #tpu.memory_space<smem>>, %arg9: memref<1x128xf32, #tpu.memory_space<vmem>>, %arg10: memref<128x128xf32, #tpu.memory_space<vmem>>) attributes {dimension_semantics = [#tpu.dimension_semantics<parallel>, #tpu.dimension_semantics<arbitrary>], iteration_bounds = array<i64: 1, 1>, scalar_prefetch = 0 : i64, scratch_operands = 1 : i64, tpu.core_type = #tpu.core_type<tc>, window_params = [{transform_indices = @transform_0, window_bounds = array<i64: 128, 1024>}, {pipeline_mode = #tpu.pipeline_mode<synchronous>, transform_indices = @transform_1, window_bounds = array<i64: 1024, 128>}, {pipeline_mode = #tpu.pipeline_mode<synchronous>, transform_indices = @transform_2, window_bounds = array<i64: 1, 128>}, {pipeline_mode = #tpu.pipeline_mode<synchronous>, transform_indices = @transform_3, window_bounds = array<i64: 128, 128>}, {pipeline_mode = #tpu.pipeline_mode<synchronous>, transform_indices = @transform_4, window_bounds = array<i64: 1, 128>}, {pipeline_mode = #tpu.pipeline_mode<synchronous>, transform_indices = @transform_5, window_bounds = array<i64: 1, 128>}, {transform_indices = @transform_6, window_bounds = array<i64: 1, 1>}, {transform_indices = @transform_7, window_bounds = array<i64: 1, 128>}]} {
    %c0_i32 = arith.constant 0 : i32
    %0 = arith.cmpi eq, %arg1, %c0_i32 : i32
    %1 = arith.extui %0 : i1 to i32
    %c0_i32_0 = arith.constant 0 : i32
    %2 = arith.cmpi ne, %1, %c0_i32_0 : i32
    scf.if %2 {
      %cst_10 = arith.constant 0.000000e+00 : f32
      %13 = vector.broadcast %cst_10 : f32 to vector<128x128xf32>
      %c0_11 = arith.constant 0 : index
      %c0_12 = arith.constant 0 : index
      %14 = vector.load %arg10[%c0_11, %c0_12] : memref<128x128xf32, #tpu.memory_space<vmem>>, vector<128x128xf32>
      tpu.vector_store %arg10[%c0_11, %c0_12], %13 {strides = array<i32>} : memref<128x128xf32, #tpu.memory_space<vmem>>, vector<128x128xf32>,
    } else {
    }
    %c0 = arith.constant 0 : index
    %c0_1 = arith.constant 0 : index
    %3 = vector.load %arg2[%c0, %c0_1] : memref<128x1024xf32, #tpu.memory_space<vmem>>, vector<128x1024xf32>
    %c0_2 = arith.constant 0 : index
    %c0_3 = arith.constant 0 : index
    %4 = vector.load %arg10[%c0_2, %c0_3] : memref<128x128xf32, #tpu.memory_space<vmem>>, vector<128x128xf32>
    %5 = arith.truncf %3 : vector<128x1024xf32> to vector<128x1024xbf16>
    %c0_4 = arith.constant 0 : index
    %c0_5 = arith.constant 0 : index
    %6 = vector.load %arg3[%c0_4, %c0_5] : memref<1024x128xbf16, #tpu.memory_space<vmem>>, vector<1024x128xbf16>
    %cst = arith.constant dense<0.000000e+00> : vector<128x128xf32>
    %7 = tpu.matmul %5, %6, %cst {dimension_numbers = #tpu.dot_dimension_numbers<[1], [0], [0], [1], [0, 0, 1, 1], [], []>} : vector<128x1024xbf16>, vector<1024x128xbf16>, vector<128x128xf32> -> vector<128x128xf32>
    %8 = arith.addf %4, %7 : vector<128x128xf32>
    %c0_6 = arith.constant 0 : index
    %c0_7 = arith.constant 0 : index
    %9 = vector.load %arg10[%c0_6, %c0_7] : memref<128x128xf32, #tpu.memory_space<vmem>>, vector<128x128xf32>
    tpu.vector_store %arg10[%c0_6, %c0_7], %8 {strides = array<i32>} : memref<128x128xf32, #tpu.memory_space<vmem>>, vector<128x128xf32>,
    %c0_i32_8 = arith.constant 0 : i32
    %10 = arith.cmpi eq, %arg1, %c0_i32_8 : i32
    %11 = arith.extui %10 : i1 to i32
    %c0_i32_9 = arith.constant 0 : i32
    %12 = arith.cmpi ne, %11, %c0_i32_9 : i32
    scf.if %12 {
      %c0_10 = arith.constant 0 : index
      %c0_11 = arith.constant 0 : index
      %13 = vector.load %arg10[%c0_10, %c0_11] : memref<128x128xf32, #tpu.memory_space<vmem>>, vector<128x128xf32>
      %c0_12 = arith.constant 0 : index
      %c0_13 = arith.constant 0 : index
      %14 = vector.load %arg4[%c0_12, %c0_13] : memref<1x128xf32, #tpu.memory_space<vmem>>, vector<1x128xf32>
      %15 = vector.broadcast %14 : vector<1x128xf32> to vector<128x128xf32>
      %16 = arith.addf %13, %15 : vector<128x128xf32>
      %cst_14 = arith.constant 0.000000e+00 : f32
      %17 = vector.broadcast %cst_14 : f32 to vector<128x128xf32>
      %18 = arith.cmpf ogt, %16, %17 : vector<128x128xf32>
      %cst_15 = arith.constant 2.000000e-01 : f32
      %19 = vector.broadcast %cst_15 : f32 to vector<128x128xf32>
      %20 = arith.mulf %19, %16 : vector<128x128xf32>
      %21 = arith.select %18, %16, %20 : vector<128x128xi1>, vector<128x128xf32>
      %22 = arith.truncf %21 : vector<128x128xf32> to vector<128x128xbf16>
      %c0_16 = arith.constant 0 : index
      %c0_17 = arith.constant 0 : index
      %23 = vector.load %arg5[%c0_16, %c0_17] : memref<128x128xbf16, #tpu.memory_space<vmem>>, vector<128x128xbf16>
      %cst_18 = arith.constant dense<0.000000e+00> : vector<128x128xf32>
      %24 = tpu.matmul %22, %23, %cst_18 {dimension_numbers = #tpu.dot_dimension_numbers<[1], [0], [0], [1], [0, 0, 1, 1], [], []>} : vector<128x128xbf16>, vector<128x128xbf16>, vector<128x128xf32> -> vector<128x128xf32>
      %c0_19 = arith.constant 0 : index
      %c0_20 = arith.constant 0 : index
      %25 = vector.load %arg6[%c0_19, %c0_20] : memref<1x128xf32, #tpu.memory_space<vmem>>, vector<1x128xf32>
      %26 = vector.broadcast %25 : vector<1x128xf32> to vector<128x128xf32>
      %27 = arith.addf %24, %26 : vector<128x128xf32>
      %cst_21 = arith.constant 0.000000e+00 : f32
      %28 = vector.broadcast %cst_21 : f32 to vector<128x128xf32>
      %29 = arith.cmpf ogt, %27, %28 : vector<128x128xf32>
      %cst_22 = arith.constant 2.000000e-01 : f32
      %30 = vector.broadcast %cst_22 : f32 to vector<128x128xf32>
      %31 = arith.mulf %30, %27 : vector<128x128xf32>
      %32 = arith.select %29, %27, %31 : vector<128x128xi1>, vector<128x128xf32>
      %33 = arith.truncf %32 : vector<128x128xf32> to vector<128x128xbf16>
      %c0_23 = arith.constant 0 : index
      %c0_24 = arith.constant 0 : index
      %34 = vector.load %arg7[%c0_23, %c0_24] : memref<1x128xbf16, #tpu.memory_space<vmem>>, vector<1x128xbf16>
      %cst_25 = arith.constant dense<0.000000e+00> : vector<1x128xf32>
      %35 = tpu.matmul %34, %33, %cst_25 {dimension_numbers = #tpu.dot_dimension_numbers<[1], [1], [0], [0], [0, 0, 1, 0], [], []>} : vector<1x128xbf16>, vector<128x128xbf16>, vector<1x128xf32> -> vector<1x128xf32>
      %c0_26 = arith.constant 0 : index
      %c0_27 = arith.constant 0 : index
      %36 = memref.load %arg8[%c0_26, %c0_27] : memref<1x1xf32, #tpu.memory_space<smem>>
      %37 = vector.broadcast %36 : f32 to vector<1x128xf32>
      %38 = arith.addf %35, %37 : vector<1x128xf32>
      %c0_28 = arith.constant 0 : index
      %c0_29 = arith.constant 0 : index
      %39 = vector.load %arg9[%c0_28, %c0_29] : memref<1x128xf32, #tpu.memory_space<vmem>>, vector<1x128xf32>
      tpu.vector_store %arg9[%c0_28, %c0_29], %38 {strides = array<i32>} : memref<1x128xf32, #tpu.memory_space<vmem>>, vector<1x128xf32>,
    } else {
    }
    return
  }
  func.func @transform_0(%arg0: i32, %arg1: i32) -> (i32, i32) {
    %c0_i32 = arith.constant 0 : i32
    return %arg0, %arg1 : i32, i32
  }
  func.func @transform_1(%arg0: i32, %arg1: i32) -> (i32, i32) {
    %c0_i32 = arith.constant 0 : i32
    %c0_i32_0 = arith.constant 0 : i32
    %c0_i32_1 = arith.constant 0 : i32
    return %c0_i32, %c0_i32_0 : i32, i32
  }
  func.func @transform_2(%arg0: i32, %arg1: i32) -> (i32, i32) {
    %c0_i32 = arith.constant 0 : i32
    %c0_i32_0 = arith.constant 0 : i32
    %c0_i32_1 = arith.constant 0 : i32
    return %c0_i32, %c0_i32_0 : i32, i32
  }
  func.func @transform_3(%arg0: i32, %arg1: i32) -> (i32, i32) {
    %c0_i32 = arith.constant 0 : i32
    %c0_i32_0 = arith.constant 0 : i32
    %c0_i32_1 = arith.constant 0 : i32
    return %c0_i32, %c0_i32_0 : i32, i32
  }
  func.func @transform_4(%arg0: i32, %arg1: i32) -> (i32, i32) {
    %c0_i32 = arith.constant 0 : i32
    %c0_i32_0 = arith.constant 0 : i32
    %c0_i32_1 = arith.constant 0 : i32
    return %c0_i32, %c0_i32_0 : i32, i32
  }
  func.func @transform_5(%arg0: i32, %arg1: i32) -> (i32, i32) {
    %c0_i32 = arith.constant 0 : i32
    %c0_i32_0 = arith.constant 0 : i32
    %c0_i32_1 = arith.constant 0 : i32
    return %c0_i32, %c0_i32_0 : i32, i32
  }
  func.func @transform_6(%arg0: i32, %arg1: i32) -> (i32, i32) {
    %c0_i32 = arith.constant 0 : i32
    %c0_i32_0 = arith.constant 0 : i32
    %c0_i32_1 = arith.constant 0 : i32
    return %c0_i32, %c0_i32_0 : i32, i32
  }
  func.func @transform_7(%arg0: i32, %arg1: i32) -> (i32, i32) {
    %c0_i32 = arith.constant 0 : i32
    %c0_i32_0 = arith.constant 0 : i32
    return %c0_i32, %arg0 : i32, i32
  }
}

</mosaic_0001>

<bundles_post_ra>
// kernel: discriminator_syn2d.1
= control target key start
LH: loop header
LB: loop body
LE: loop exit
PB: predicated region body
PF: predicated region fallthrough
CT: control target
= control target key end

     0   :  { %13 = vsyncpa [#allocation5], 0  ;;  %s4440_s0 = inlined_call_operand.vmem [shape: f32[2,1024], index: 0, kind: input, shape index: {}]   ;;  %s4441_s1 = inlined_call_operand.hbm [shape: bf16[1024,128], index: 1, kind: input, shape index: {}]   ;;  %s4442_s2 = inlined_call_operand.vmem [shape: f32[1,128], index: 2, kind: input, shape index: {}]   ;;  %s4443_s3 = inlined_call_operand.vmem [shape: bf16[128,128], index: 3, kind: input, shape index: {}]   ;;  %s4444_s4 = inlined_call_operand.vmem [shape: f32[1,128], index: 4, kind: input, shape index: {}]   ;;  %s4445_s5 = inlined_call_operand.vmem [shape: bf16[1,128], index: 5, kind: input, shape index: {}]   ;;  %s4446_s6 = inlined_call_operand.<no memory space> [shape: f32[1,1], index: 6, kind: input, shape index: {}]   ;;  %s4447_s7 = inlined_call_operand.hbm [shape: f32[1,2], index: 7, kind: output, shape index: {}]  }
   0x1   :  { %14 = vsyncpa [#allocation6], 0  ;;  %s3718_s24 = smov [#allocation4]   ;;  %s3670_s28 = scalar_lea.hbm %s4441_s1, 8192 }
   0x2   :  { %s22_s25 = sshll.u32 %s3718_s24, 4  ;;  %p3671_p0 = scmp.ne.s32.totalorder %s4441_s1, %s3670_s28  ;;  %s23_s25 = int_to_ptr.vmem [resolvable:$true] %s22_s25 }
   0x3   :  { %p3674_p1 = scmp.lt.u32.totalorder %s3670_s28, %s4441_s1 }
   0x5   :  { %p3676_p2 = pnand %p3674_p1, %p3671_p0 }
   0x7   :  { %3679 = shalt.err (!%p3676_p2)
}
   0x8   :  { %s3680_s10 = scalar_lea.vmem %s23_s25, 8192  ;;  %p3685_p4 = scmp.lt.s32.totalorder %s23_s25, %s23_s25 }
   0x9   :  { %p3681_p3 = scmp.ne.s32.totalorder %s23_s25, %s3680_s10  ;;  %p3686_p5 = scmp.lt.s32.totalorder %s3680_s10, %s3680_s10 }
   0xb   :  { %p3687_p6 = por %p3686_p5, %p3685_p4 }
   0xd   :  { %p3688_p7 = pnand %p3687_p6, %p3681_p3 }
   0xf   :  { %3691 = shalt.err (!%p3688_p7)
}
  0x10   :  { %s3719_s11 = smov 64   ;;  %s3720_s12 = smov 4  }
  0x11   :  { %28 = dma.hbm_to_vmem [thread:$0]  %s4441_s1, 8192, %s23_s25, [#allocation5], %s3719_s11, %s3719_s11, %s3720_s12  }
  0x12   :  { %3714 = dma.done.wait [#allocation5], 8192  }
  0x13   :  { %3715 = vsyncadd [#allocation5], 4294959104  ;;  %v3406_v0 = vld [vmem:[#allocation4 + $0x40] sm:$0xff]   ;;  %v3410_v4 = vld [vmem:[#allocation4 + $0x48] sm:$0xff]   ;;  %v3721_v25 = vmov 1983009808   ;;  %v342_v27 = vlaneseq }
  0x14   :  { %v3407_v1 = vld [vmem:[#allocation4 + $0xc0] sm:$0xff]   ;;  %3066 = vmatprep.subr.bf16.mxu0 %v3406_v0  ;;  %v3411_v5 = vld [vmem:[#allocation4 + $0xc8] sm:$0xff]   ;;  %v3414_v8 = vld [vmem:[#allocation4 + $0x50] sm:$0xff]   ;;  %v340_v26 = vunpack.c.l.s4 %v3721_v25  ;;  %s3724_s26 = smov [#allocation7]  }
  0x15   :  { %v3408_v2 = vld [vmem:[#allocation4] sm:$0xff]   ;;  %3130 = vmatprep.subr.bf16.mxu1 %v3407_v1  ;;  %v3412_v6 = vld [vmem:[#allocation4 + $0x8] sm:$0xff]   ;;  %v3415_v9 = vld [vmem:[#allocation4 + $0xd0] sm:$0xff]   ;;  %v343_v33 = vshrl.u32 %v342_v27, 7  ;;  %s2983_s27 = sshll.u32 %s3724_s26, 4  ;;  %s2984_s27 = int_to_ptr.vmem [resolvable:$true] %s2983_s27 }
  0x16   :  { %v3409_v3 = vld [vmem:[#allocation4 + $0x80] sm:$0xff]   ;;  %3067 = vmatpush3.bf16.msra.mxu0 %v3408_v2  ;;  %v3413_v7 = vld [vmem:[#allocation4 + $0x88] sm:$0xff]   ;;  %v3416_v10 = vld [vmem:[#allocation4 + $0x10] sm:$0xff]   ;;  %v341_v32 = vunpack.c.0.s8 %v340_v26  ;;  %s3692_s28 = scalar_lea.vmem %s2984_s27, 16  ;;  %s3696_s29 = scalar_lea.vmem %s2984_s27, 32 }
  0x17   :  { %3131 = vmatpush3.bf16.msra.mxu1 %v3409_v3  ;;  %3068 = vmatprep.subr.bf16.mxu0 %v3410_v4  ;;  %v3417_v11 = vld [vmem:[#allocation4 + $0x90] sm:$0xff]   ;;  %v3418_v12 = vld [vmem:[#allocation4 + $0x58] sm:$0xff]   ;;  %v3422_v16 = vld [vmem:[#allocation4 + $0x60] sm:$0xff]   ;;  %p3693_p8 = scmp.ne.s32.totalorder %s2984_s27, %s3692_s28  ;;  %p3697_p9 = scmp.lt.s32.totalorder %s2984_s27, %s2984_s27 }
  0x18   :  { %3132 = vmatprep.subr.bf16.mxu1 %v3411_v5  ;;  %v3419_v13 = vld [vmem:[#allocation4 + $0xd8] sm:$0xff]   ;;  %v3423_v17 = vld [vmem:[#allocation4 + $0xe0] sm:$0xff]   ;;  %v3426_v20 = vld [vmem:[#allocation4 + $0x68] sm:$0xff]   ;;  %v3777_v37 = vsub.s32 %v341_v32, %v343_v33  ;;  %p3698_p10 = scmp.lt.s32.totalorder %s3696_s29, %s3692_s28 }
  0x19   :  { %v3420_v14 = vld [vmem:[#allocation4 + $0x18] sm:$0xff]   ;;  %v3424_v18 = vld [vmem:[#allocation4 + $0x20] sm:$0xff]   ;;  %v3427_v21 = vld [vmem:[#allocation4 + $0xe8] sm:$0xff]  }
  0x1a   :  { %3069 = vmatpush3.bf16.msra.mxu0 %v3412_v6  ;;  %v3421_v15 = vld [vmem:[#allocation4 + $0x98] sm:$0xff]   ;;  %v3425_v19 = vld [vmem:[#allocation4 + $0xa0] sm:$0xff]   ;;  %v3428_v22 = vld [vmem:[#allocation4 + $0x28] sm:$0xff]   ;;  %p3699_p11 = por %p3698_p10, %p3697_p9 }
  0x1b   :  { %3133 = vmatpush3.bf16.msra.mxu1 %v3413_v7  ;;  %3070 = vmatprep.subr.bf16.mxu0 %v3414_v8  ;;  %v3429_v23 = vld [vmem:[#allocation4 + $0xa8] sm:$0xff]   ;;  %v3430_v24 = vld [vmem:[#allocation4 + $0x70] sm:$0xff]   ;;  %v3434_v31 = vld [vmem:[#allocation4 + $0x78] sm:$0xff]  }
  0x1c   :  { %3134 = vmatprep.subr.bf16.mxu1 %v3415_v9  ;;  %v3431_v28 = vld [vmem:[#allocation4 + $0xf0] sm:$0xff]   ;;  %v3435_v34 = vld [vmem:[#allocation4 + $0xf8] sm:$0xff]   ;;  %v3450_v53 = vld [vmem:[#allocation4 + $0x140] sm:$0xff]   ;;  %p3700_p12 = pnand %p3699_p11, %p3693_p8 }
  0x1d   :  { %v3432_v29 = vld [vmem:[#allocation4 + $0x30] sm:$0xff]   ;;  %v3436_v35 = vld [vmem:[#allocation4 + $0x38] sm:$0xff]   ;;  %v3451_v58 = vld [vmem:[#allocation4 + $0x100] sm:$0xff]  }
  0x1e   :  { %3071 = vmatpush3.bf16.msra.mxu0 %v3416_v10  ;;  %v3433_v30 = vld [vmem:[#allocation4 + $0xb0] sm:$0xff]   ;;  %v3437_v36 = vld [vmem:[#allocation4 + $0xb8] sm:$0xff]   ;;  %v3452_v62 = vld [vmem:[#allocation4 + $0x1c0] sm:$0xff]  }
  0x1f   :  { %3135 = vmatpush3.bf16.msra.mxu1 %v3417_v11  ;;  %3072 = vmatprep.subr.bf16.mxu0 %v3418_v12  ;;  %v3438_v38 = vld [vmem:[%s4440_s0] ss:$16 sps:$4 sm:$0xff]   ;;  %v3446_v43 = vld [vmem:[%s4440_s0 + $0x4] ss:$16 sps:$4 sm:$0xff]   ;;  %v3467_v25 = vld [vmem:[#allocation4 + $0x108] sm:$0xff]  }
  0x20   :  { %3136 = vmatprep.subr.bf16.mxu1 %v3419_v13  ;;  %v3440_v39 = vld [vmem:[%s4440_s0 + $0x20] ss:$16 sps:$4 sm:$0xff]   ;;  %v345_v42 = vrot.slane %v3438_v38, %v3777_v37  ;;  %v3447_v44 = vld [vmem:[%s4440_s0 + $0x24] ss:$16 sps:$4 sm:$0xff]   ;;  %v352_v50 = vrot.slane %v3446_v43, %v3777_v37  ;;  %v3469_v33 = vld [vmem:[#allocation4 + $0x188] sm:$0xff]  }
  0x21   :  { %v3442_v40 = vld [vmem:[%s4440_s0 + $0x40] ss:$16 sps:$4 sm:$0xff]   ;;  %v3448_v45 = vld [vmem:[%s4440_s0 + $0x44] ss:$16 sps:$4 sm:$0xff]   ;;  %v359_v46 = vrot.slane %v3440_v39, %v3777_v37  ;;  %v366_v51 = vrot.slane %v3447_v44, %v3777_v37 }
  0x22   :  { %3073 = vmatpush3.bf16.msra.mxu0 %v3420_v14  ;;  %v3444_v41 = vld [vmem:[%s4440_s0 + $0x60] ss:$16 sps:$4 sm:$0xff]   ;;  %v417_v47 = vrot.slane %v3442_v40, %v3777_v37  ;;  %v3449_v49 = vld [vmem:[%s4440_s0 + $0x64] ss:$16 sps:$4 sm:$0xff]   ;;  %v424_v52 = vrot.slane %v3448_v45, %v3777_v37 }
  0x23   :  { %3137 = vmatpush3.bf16.msra.mxu1 %v3421_v15  ;;  %3074 = vmatprep.subr.bf16.mxu0 %v3422_v16  ;;  %v431_v48 = vrot.slane %v3444_v41, %v3777_v37  ;;  %v368_v54 = vcombine.high %v345_v42, %v359_v46  ;;  %v438_v56 = vrot.slane %v3449_v49, %v3777_v37  ;;  %v3453_v2 = vld [vmem:[#allocation4 + $0x180] sm:$0xff]  }
  0x24   :  { %3138 = vmatprep.subr.bf16.mxu1 %v3423_v17  ;;  %v367_v57 = vcombine.low %v345_v42, %v359_v46  ;;  %v370_v59 = vcombine.high %v352_v50, %v366_v51  ;;  %v369_v61 = vcombine.low %v352_v50, %v366_v51  ;;  %v3454_v6 = vld [vmem:[%s4440_s0 + $0x80] ss:$16 sps:$4 sm:$0xff]   ;;  %v3462_v10 = vld [vmem:[%s4440_s0 + $0x84] ss:$16 sps:$4 sm:$0xff]  }
  0x25   :  { %v440_v55 = vcombine.high %v417_v47, %v431_v48  ;;  %v439_v60 = vcombine.low %v417_v47, %v431_v48  ;;  %v442_v0 = vcombine.high %v424_v52, %v438_v56  ;;  %v441_v1 = vcombine.low %v424_v52, %v438_v56  ;;  %v3456_v7 = vld [vmem:[%s4440_s0 + $0xa0] ss:$16 sps:$4 sm:$0xff]   ;;  %v3463_v11 = vld [vmem:[%s4440_s0 + $0xa4] ss:$16 sps:$4 sm:$0xff]  }
  0x26   :  { %3075 = vmatpush3.bf16.msra.mxu0 %v3424_v18  ;;  %v3458_v8 = vld [vmem:[%s4440_s0 + $0xc0] ss:$16 sps:$4 sm:$0xff]   ;;  %v489_v12 = vrot.slane %v3454_v6, %v3777_v37  ;;  %v503_v13 = vrot.slane %v3456_v7, %v3777_v37  ;;  %v3464_v15 = vld [vmem:[%s4440_s0 + $0xc4] ss:$16 sps:$4 sm:$0xff]   ;;  %v496_v18 = vrot.slane %v3462_v10, %v3777_v37 }
  0x27   :  { %3139 = vmatpush3.bf16.msra.mxu1 %v3425_v19  ;;  %3076 = vmatprep.subr.bf16.mxu0 %v3426_v20  ;;  %v1616_v63 = vpack.c.bf16 %v440_v55, %v368_v54  ;;  %v1615_v3 = vpack.c.bf16 %v439_v60, %v367_v57  ;;  %v1618_v4 = vpack.c.bf16 %v442_v0, %v370_v59  ;;  %v3460_v9 = vld [vmem:[%s4440_s0 + $0xe0] ss:$16 sps:$4 sm:$0xff]   ;;  %v3465_v16 = vld [vmem:[%s4440_s0 + $0xe4] ss:$16 sps:$4 sm:$0xff]   ;;  %v3466_v20 = vld [vmem:[#allocation4 + $0x148] sm:$0xff]  }
  0x28   :  { %3140 = vmatprep.subr.bf16.mxu1 %v3427_v21  ;;  %v1617_v5 = vpack.c.bf16 %v441_v1, %v369_v61  ;;  %v561_v14 = vrot.slane %v3458_v8, %v3777_v37  ;;  %v575_v17 = vrot.slane %v3460_v9, %v3777_v37  ;;  %v510_v19 = vrot.slane %v3463_v11, %v3777_v37  ;;  %v3470_v39 = vld [vmem:[%s4440_s0 + $0x100] ss:$16 sps:$4 sm:$0xff]   ;;  %v3478_v43 = vld [vmem:[%s4440_s0 + $0x104] ss:$16 sps:$4 sm:$0xff]  }
  0x29   :  { %2223 = vmatprep.mubr.bf16.mxu0 %v1616_v63  ;;  %2320 = vmatprep.mubr.bf16.mxu1 %v1618_v4  ;;  %v512_v21 = vcombine.high %v489_v12, %v503_v13  ;;  %v3472_v40 = vld [vmem:[%s4440_s0 + $0x120] ss:$16 sps:$4 sm:$0xff]   ;;  %v633_v44 = vrot.slane %v3470_v39, %v3777_v37  ;;  %v3479_v46 = vld [vmem:[%s4440_s0 + $0x124] ss:$16 sps:$4 sm:$0xff]   ;;  %v640_v51 = vrot.slane %v3478_v43, %v3777_v37 }
  0x2a   :  { %3077 = vmatpush3.bf16.msra.mxu0 %v3428_v22  ;;  %v568_v22 = vrot.slane %v3464_v15, %v3777_v37  ;;  %v584_v26 = vcombine.high %v561_v14, %v575_v17  ;;  %v514_v27 = vcombine.high %v496_v18, %v510_v19  ;;  %v3474_v41 = vld [vmem:[%s4440_s0 + $0x140] ss:$16 sps:$4 sm:$0xff]   ;;  %v647_v45 = vrot.slane %v3472_v40, %v3777_v37  ;;  %v3480_v47 = vld [vmem:[%s4440_s0 + $0x144] ss:$16 sps:$4 sm:$0xff]  }
  0x2b   :  { %3141 = vmatpush3.bf16.msra.mxu1 %v3429_v23  ;;  %3078 = vmatprep.subr.bf16.mxu0 %v3430_v24  ;;  %v582_v23 = vrot.slane %v3465_v16, %v3777_v37  ;;  %v511_v24 = vcombine.low %v489_v12, %v503_v13  ;;  %v3476_v42 = vld [vmem:[%s4440_s0 + $0x160] ss:$16 sps:$4 sm:$0xff]   ;;  %v3481_v48 = vld [vmem:[%s4440_s0 + $0x164] ss:$16 sps:$4 sm:$0xff]   ;;  %v705_v49 = vrot.slane %v3474_v41, %v3777_v37 }
  0x2c   :  { %3142 = vmatprep.subr.bf16.mxu1 %v3431_v28  ;;  %v583_v28 = vcombine.low %v561_v14, %v575_v17  ;;  %v719_v50 = vrot.slane %v3476_v42, %v3777_v37  ;;  %v3482_v52 = vld [vmem:[#allocation4 + $0x150] sm:$0xff]   ;;  %v654_v54 = vrot.slane %v3479_v46, %v3777_v37  ;;  %v712_v55 = vrot.slane %v3480_v47, %v3777_v37 }
  0x2d   :  { %v585_v32 = vcombine.low %v568_v22, %v582_v23  ;;  %v726_v56 = vrot.slane %v3481_v48, %v3777_v37  ;;  %v3483_v57 = vld [vmem:[#allocation4 + $0x110] sm:$0xff]   ;;  %v655_v59 = vcombine.low %v633_v44, %v647_v45 }
  0x2e   :  { %3079 = vmatpush3.bf16.msra.mxu0 %v3432_v29  ;;  %v513_v29 = vcombine.low %v496_v18, %v510_v19  ;;  %v727_v60 = vcombine.low %v705_v49, %v719_v50  ;;  %v3484_v61 = vld [vmem:[#allocation4 + $0x1d0] sm:$0xff]   ;;  %v657_v0 = vcombine.low %v640_v51, %v654_v54 }
  0x2f   :  { %3143 = vmatpush3.bf16.msra.mxu1 %v3433_v30  ;;  %3080 = vmatprep.subr.bf16.mxu0 %v3434_v31  ;;  %v3468_v30 = vld [vmem:[#allocation4 + $0x1c8] sm:$0xff]   ;;  %v586_v31 = vcombine.high %v568_v22, %v582_v23  ;;  %v730_v63 = vcombine.high %v712_v55, %v726_v56  ;;  %v729_v1 = vcombine.low %v712_v55, %v726_v56  ;;  %v3486_v7 = vld [vmem:[%s4440_s0 + $0x180] ss:$16 sps:$4 sm:$0xff]   ;;  %v3494_v12 = vld [vmem:[%s4440_s0 + $0x184] ss:$16 sps:$4 sm:$0xff]  }
  0x30   :  { %3144 = vmatprep.subr.bf16.mxu1 %v3435_v34  ;;  %v1624_v34 = vpack.c.bf16 %v584_v26, %v512_v21  ;;  %v1625_v38 = vpack.c.bf16 %v585_v32, %v513_v29  ;;  %v1631_v4 = vpack.c.bf16 %v727_v60, %v655_v59  ;;  %v3488_v8 = vld [vmem:[%s4440_s0 + $0x1a0] ss:$16 sps:$4 sm:$0xff]   ;;  %v777_v11 = vrot.slane %v3486_v7, %v3777_v37  ;;  %v3495_v13 = vld [vmem:[%s4440_s0 + $0x1a4] ss:$16 sps:$4 sm:$0xff]   ;;  %v3498_v22 = vld [vmem:[#allocation4 + $0x158] sm:$0xff]  }
  0x31   :  { %v1633_v6 = vpack.c.bf16 %v729_v1, %v657_v0  ;;  %v3490_v9 = vld [vmem:[%s4440_s0 + $0x1c0] ss:$16 sps:$4 sm:$0xff]   ;;  %v3496_v14 = vld [vmem:[%s4440_s0 + $0x1c4] ss:$16 sps:$4 sm:$0xff]   ;;  %v791_v15 = vrot.slane %v3488_v8, %v3777_v37  ;;  %v784_v19 = vrot.slane %v3494_v12, %v3777_v37 }
  0x32   :  { %3081 = vmatpush3.bf16.msra.mxu0 %v3436_v35  ;;  %v1623_v35 = vpack.c.bf16 %v583_v28, %v511_v24  ;;  %v3492_v10 = vld [vmem:[%s4440_s0 + $0x1e0] ss:$16 sps:$4 sm:$0xff]   ;;  %v849_v16 = vrot.slane %v3490_v9, %v3777_v37  ;;  %v3497_v18 = vld [vmem:[%s4440_s0 + $0x1e4] ss:$16 sps:$4 sm:$0xff]   ;;  %v856_v21 = vrot.slane %v3496_v14, %v3777_v37 }
  0x33   :  { %3145 = vmatpush3.bf16.msra.mxu1 %v3437_v36  ;;  %3194 = vmatprep.subr.bf16.mxu0 %v3450_v53  ;;  %v1626_v36 = vpack.c.bf16 %v586_v31, %v514_v27  ;;  %v656_v53 = vcombine.high %v633_v44, %v647_v45  ;;  %v863_v17 = vrot.slane %v3492_v10, %v3777_v37  ;;  %v3499_v27 = vld [vmem:[#allocation4 + $0x118] sm:$0xff]   ;;  %v3502_v40 = vld [vmem:[%s4440_s0 + $0x200] ss:$16 sps:$4 sm:$0xff]   ;;  %v3510_v44 = vld [vmem:[%s4440_s0 + $0x204] ss:$16 sps:$4 sm:$0xff]  }
  0x34   :  { %3258 = vmatprep.subr.bf16.mxu1 %v3452_v62  ;;  %v658_v62 = vcombine.high %v640_v51, %v654_v54  ;;  %v800_v23 = vcombine.high %v777_v11, %v791_v15  ;;  %v799_v26 = vcombine.low %v777_v11, %v791_v15  ;;  %v3500_v31 = vld [vmem:[#allocation4 + $0x1d8] sm:$0xff]   ;;  %v3504_v41 = vld [vmem:[%s4440_s0 + $0x220] ss:$16 sps:$4 sm:$0xff]   ;;  %v3511_v45 = vld [vmem:[%s4440_s0 + $0x224] ss:$16 sps:$4 sm:$0xff]   ;;  %v921_v46 = vrot.slane %v3502_v40, %v3777_v37 }
  0x35   :  { %2224 = vmatmul.mubr.bf16.vlgmr.msra.gmra.mrb[0].mxu0 %v1615_v3  ;;  %v872_v24 = vcombine.high %v849_v16, %v863_v17  ;;  %v871_v29 = vcombine.low %v849_v16, %v863_v17  ;;  %v3506_v42 = vld [vmem:[%s4440_s0 + $0x240] ss:$16 sps:$4 sm:$0xff]   ;;  %v935_v47 = vrot.slane %v3504_v41, %v3777_v37  ;;  %v3526_v12 = vld [vmem:[%s4440_s0 + $0x284] ss:$16 sps:$4 sm:$0xff]  }
  0x36   :  { %3195 = vmatpush3.bf16.msra.mxu0 %v3451_v58  ;;  %2321 = vmatmul.mubr.bf16.vlgmr.msra.gmra.mrb[0].mxu1 %v1617_v5  ;;  %v728_v58 = vcombine.high %v705_v49, %v719_v50  ;;  %v1634_v5 = vpack.c.bf16 %v730_v63, %v658_v62  ;;  %v3508_v43 = vld [vmem:[%s4440_s0 + $0x260] ss:$16 sps:$4 sm:$0xff]   ;;  %v993_v48 = vrot.slane %v3506_v42, %v3777_v37  ;;  %v3512_v49 = vld [vmem:[%s4440_s0 + $0x244] ss:$16 sps:$4 sm:$0xff]  }
  0x37   :  { %3259 = vmatpush3.bf16.msra.mxu1 %v3453_v2  ;;  %3196 = vmatprep.subr.bf16.mxu0 %v3466_v20  ;;  %v3485_v2 = vld [vmem:[#allocation4 + $0x190] sm:$0xff]   ;;  %v798_v20 = vrot.slane %v3495_v13, %v3777_v37  ;;  %v1640_v32 = vpack.c.bf16 %v872_v24, %v800_v23  ;;  %v1007_v51 = vrot.slane %v3508_v43, %v3777_v37  ;;  %v3514_v54 = vld [vmem:[#allocation4 + $0x160] sm:$0xff]  }
  0x38   :  { %3260 = vmatprep.subr.bf16.mxu1 %v3468_v30  ;;  %2231 = vmatprep.mubr.bf16.mxu0 %v1624_v34  ;;  %v1632_v3 = vpack.c.bf16 %v728_v58, %v656_v53  ;;  %v3513_v50 = vld [vmem:[%s4440_s0 + $0x264] ss:$16 sps:$4 sm:$0xff]   ;;  %v942_v53 = vrot.slane %v3511_v45, %v3777_v37  ;;  %v944_v55 = vcombine.high %v921_v46, %v935_v47  ;;  %v3518_v8 = vld [vmem:[%s4440_s0 + $0x280] ss:$16 sps:$4 sm:$0xff]  }
  0x39   :  { %2328 = vmatprep.mubr.bf16.mxu1 %v1626_v36  ;;  %v802_v28 = vcombine.high %v784_v19, %v798_v20  ;;  %v801_v30 = vcombine.low %v784_v19, %v798_v20  ;;  %v1639_v36 = vpack.c.bf16 %v871_v29, %v799_v26  ;;  %v1000_v56 = vrot.slane %v3512_v49, %v3777_v37  ;;  %v3515_v59 = vld [vmem:[#allocation4 + $0x120] sm:$0xff]   ;;  %v3531_v26 = vld [vmem:[#allocation4 + $0x128] sm:$0xff]  }
  0x3a   :  { %3197 = vmatpush3.bf16.msra.mxu0 %v3467_v25  ;;  %v870_v25 = vrot.slane %v3497_v18, %v3777_v37  ;;  %v943_v58 = vcombine.low %v921_v46, %v935_v47  ;;  %v1016_v60 = vcombine.high %v993_v48, %v1007_v51  ;;  %v1015_v62 = vcombine.low %v993_v48, %v1007_v51  ;;  %v3516_v0 = vld [vmem:[#allocation4 + $0x1e0] sm:$0xff]  }
  0x3b   :  { %3261 = vmatpush3.bf16.msra.mxu1 %v3469_v33  ;;  %3198 = vmatprep.subr.bf16.mxu0 %v3482_v52  ;;  %v928_v52 = vrot.slane %v3510_v44, %v3777_v37  ;;  %v3520_v9 = vld [vmem:[%s4440_s0 + $0x2a0] ss:$16 sps:$4 sm:$0xff]   ;;  %v1065_v13 = vrot.slane %v3518_v8, %v3777_v37  ;;  %v3527_v15 = vld [vmem:[%s4440_s0 + $0x2a4] ss:$16 sps:$4 sm:$0xff]   ;;  %v1072_v20 = vrot.slane %v3526_v12, %v3777_v37 }
  0x3c   :  { %3262 = vmatprep.subr.bf16.mxu1 %v3484_v61  ;;  %v874_v33 = vcombine.high %v856_v21, %v870_v25  ;;  %v873_v34 = vcombine.low %v856_v21, %v870_v25  ;;  %v3522_v10 = vld [vmem:[%s4440_s0 + $0x2c0] ss:$16 sps:$4 sm:$0xff]   ;;  %v1079_v14 = vrot.slane %v3520_v9, %v3777_v37  ;;  %v3528_v16 = vld [vmem:[%s4440_s0 + $0x2c4] ss:$16 sps:$4 sm:$0xff]   ;;  %v3530_v21 = vld [vmem:[#allocation4 + $0x168] sm:$0xff]   ;;  %v1086_v23 = vrot.slane %v3527_v15, %v3777_v37 }
  0x3d   :  { %2232 = vmatmul.mubr.bf16.gmra.mrb[4].mxu0 %v1623_v35  ;;  %v3501_v35 = vld [vmem:[#allocation4 + $0x198] sm:$0xff]   ;;  %v946_v61 = vcombine.high %v928_v52, %v942_v53  ;;  %v945_v63 = vcombine.low %v928_v52, %v942_v53  ;;  %v3524_v11 = vld [vmem:[%s4440_s0 + $0x2e0] ss:$16 sps:$4 sm:$0xff]   ;;  %v3529_v17 = vld [vmem:[%s4440_s0 + $0x2e4] ss:$16 sps:$4 sm:$0xff]   ;;  %v1137_v18 = vrot.slane %v3522_v10, %v3777_v37  ;;  %v1144_v24 = vrot.slane %v3528_v16, %v3777_v37 }
  0x3e   :  { %2329 = vmatmul.mubr.bf16.gmra.mrb[4].mxu1 %v1625_v38  ;;  %3199 = vmatpush3.bf16.msra.mxu0 %v3483_v57  ;;  %v1642_v38 = vpack.c.bf16 %v874_v33, %v802_v28  ;;  %v1641_v39 = vpack.c.bf16 %v873_v34, %v801_v30  ;;  %v1014_v57 = vrot.slane %v3513_v50, %v3777_v37  ;;  %v3532_v30 = vld [vmem:[#allocation4 + $0x1e8] sm:$0xff]   ;;  %v3534_v41 = vld [vmem:[%s4440_s0 + $0x300] ss:$16 sps:$4 sm:$0xff]   ;;  %v3542_v46 = vld [vmem:[%s4440_s0 + $0x304] ss:$16 sps:$4 sm:$0xff]  }
  0x3f   :  { %3263 = vmatpush3.bf16.msra.mxu1 %v3485_v2  ;;  %2239 = vmatprep.mubr.bf16.mxu0 %v1632_v3  ;;  %v3517_v3 = vld [vmem:[#allocation4 + $0x1a0] sm:$0xff]   ;;  %v1151_v19 = vrot.slane %v3524_v11, %v3777_v37  ;;  %v1158_v25 = vrot.slane %v3529_v17, %v3777_v37  ;;  %v1087_v28 = vcombine.low %v1065_v13, %v1079_v14 }
  0x40   :  { %2336 = vmatprep.mubr.bf16.mxu1 %v1634_v5  ;;  %3200 = vmatprep.subr.bf16.mxu0 %v3498_v22  ;;  %v1018_v1 = vcombine.high %v1000_v56, %v1014_v57  ;;  %v1017_v2 = vcombine.low %v1000_v56, %v1014_v57  ;;  %v1647_v5 = vpack.c.bf16 %v1015_v62, %v943_v58  ;;  %v3536_v42 = vld [vmem:[%s4440_s0 + $0x320] ss:$16 sps:$4 sm:$0xff]   ;;  %v3543_v47 = vld [vmem:[%s4440_s0 + $0x324] ss:$16 sps:$4 sm:$0xff]  }
  0x41   :  { %3264 = vmatprep.subr.bf16.mxu1 %v3500_v31  ;;  %v1088_v22 = vcombine.high %v1065_v13, %v1079_v14  ;;  %v1159_v29 = vcombine.low %v1137_v18, %v1151_v19  ;;  %v1090_v31 = vcombine.high %v1072_v20, %v1086_v23  ;;  %v1089_v33 = vcombine.low %v1072_v20, %v1086_v23  ;;  %v3538_v43 = vld [vmem:[%s4440_s0 + $0x340] ss:$16 sps:$4 sm:$0xff]   ;;  %v3544_v48 = vld [vmem:[%s4440_s0 + $0x344] ss:$16 sps:$4 sm:$0xff]   ;;  %v3562_v23 = vld [vmem:[#allocation4 + $0x178] sm:$0xff]  }
  0x42   :  { %3201 = vmatpush3.bf16.msra.mxu0 %v3499_v27  ;;  %v1649_v7 = vpack.c.bf16 %v1017_v2, %v945_v63  ;;  %v1160_v27 = vcombine.high %v1137_v18, %v1151_v19  ;;  %v1161_v34 = vcombine.low %v1144_v24, %v1158_v25  ;;  %v3540_v44 = vld [vmem:[%s4440_s0 + $0x360] ss:$16 sps:$4 sm:$0xff]   ;;  %v1209_v45 = vrot.slane %v3534_v41, %v3777_v37  ;;  %v3545_v52 = vld [vmem:[%s4440_s0 + $0x364] ss:$16 sps:$4 sm:$0xff]  }
  0x43   :  { %3265 = vmatpush3.bf16.msra.mxu1 %v3501_v35  ;;  %3202 = vmatprep.subr.bf16.mxu0 %v3514_v54  ;;  %v3533_v35 = vld [vmem:[#allocation4 + $0x1a8] sm:$0xff]   ;;  %v1223_v49 = vrot.slane %v3536_v42, %v3777_v37  ;;  %v1281_v50 = vrot.slane %v3538_v43, %v3777_v37  ;;  %v1295_v51 = vrot.slane %v3540_v44, %v3777_v37  ;;  %v3546_v56 = vld [vmem:[#allocation4 + $0x170] sm:$0xff]  }
  0x44   :  { %3266 = vmatprep.subr.bf16.mxu1 %v3516_v0  ;;  %v1657_v40 = vpack.c.bf16 %v1161_v34, %v1089_v33  ;;  %v1216_v53 = vrot.slane %v3542_v46, %v3777_v37  ;;  %v1230_v54 = vrot.slane %v3543_v47, %v3777_v37  ;;  %v3550_v9 = vld [vmem:[%s4440_s0 + $0x380] ss:$16 sps:$4 sm:$0xff]   ;;  %v3558_v13 = vld [vmem:[%s4440_s0 + $0x384] ss:$16 sps:$4 sm:$0xff]   ;;  %v3564_v33 = vld [vmem:[#allocation4 + $0x1f8] sm:$0xff]  }
  0x45   :  { %2240 = vmatmul.mubr.bf16.gmra.mrb[8].mxu0 %v1631_v4  ;;  %v1648_v4 = vpack.c.bf16 %v1016_v60, %v944_v55  ;;  %v1288_v55 = vrot.slane %v3544_v48, %v3777_v37  ;;  %v1232_v57 = vcombine.high %v1209_v45, %v1223_v49  ;;  %v1304_v58 = vcombine.high %v1281_v50, %v1295_v51  ;;  %v3552_v10 = vld [vmem:[%s4440_s0 + $0x3a0] ss:$16 sps:$4 sm:$0xff]   ;;  %v3559_v14 = vld [vmem:[%s4440_s0 + $0x3a4] ss:$16 sps:$4 sm:$0xff]   ;;  %v3566_v42 = vld [vmem:[%s4440_s0 + $0x8] ss:$16 sps:$4 sm:$0xff]  }
  0x46   :  { %2337 = vmatmul.mubr.bf16.gmra.mrb[8].mxu1 %v1633_v6  ;;  %2247 = vmatprep.mubr.bf16.mxu0 %v1640_v32  ;;  %v1650_v6 = vpack.c.bf16 %v1018_v1, %v946_v61  ;;  %v1162_v32 = vcombine.high %v1144_v24, %v1158_v25  ;;  %v1231_v60 = vcombine.low %v1209_v45, %v1223_v49  ;;  %v3547_v61 = vld [vmem:[#allocation4 + $0x130] sm:$0xff]   ;;  %v3568_v43 = vld [vmem:[%s4440_s0 + $0x28] ss:$16 sps:$4 sm:$0xff]   ;;  %v3574_v46 = vld [vmem:[%s4440_s0 + $0xc] ss:$16 sps:$4 sm:$0xff]  }
  0x47   :  { %2344 = vmatprep.mubr.bf16.mxu1 %v1642_v38  ;;  %3203 = vmatpush3.bf16.msra.mxu0 %v3515_v59  ;;  %v1655_v38 = vpack.c.bf16 %v1159_v29, %v1087_v28  ;;  %v1302_v59 = vrot.slane %v3545_v52, %v3777_v37  ;;  %v1234_v62 = vcombine.high %v1216_v53, %v1230_v54  ;;  %v3548_v1 = vld [vmem:[#allocation4 + $0x1f0] sm:$0xff]   ;;  %v3563_v28 = vld [vmem:[#allocation4 + $0x138] sm:$0xff]  }
  0x48   :  { %3267 = vmatpush3.bf16.msra.mxu1 %v3517_v3  ;;  %3204 = vmatprep.subr.bf16.mxu0 %v3530_v21  ;;  %v1303_v63 = vcombine.low %v1281_v50, %v1295_v51  ;;  %v1233_v0 = vcombine.low %v1216_v53, %v1230_v54  ;;  %v1664_v2 = vpack.c.bf16 %v1304_v58, %v1232_v57  ;;  %v3554_v11 = vld [vmem:[%s4440_s0 + $0x3c0] ss:$16 sps:$4 sm:$0xff]   ;;  %v3560_v18 = vld [vmem:[%s4440_s0 + $0x3c4] ss:$16 sps:$4 sm:$0xff]   ;;  %v3570_v44 = vld [vmem:[%s4440_s0 + $0x48] ss:$16 sps:$4 sm:$0xff]  }
  0x49   :  { %3268 = vmatprep.subr.bf16.mxu1 %v3532_v30  ;;  %v1306_v3 = vcombine.high %v1288_v55, %v1302_v59  ;;  %v3556_v12 = vld [vmem:[%s4440_s0 + $0x3e0] ss:$16 sps:$4 sm:$0xff]   ;;  %v1353_v15 = vrot.slane %v3550_v9, %v3777_v37  ;;  %v1367_v16 = vrot.slane %v3552_v10, %v3777_v37  ;;  %v1425_v17 = vrot.slane %v3554_v11, %v3777_v37  ;;  %v3561_v19 = vld [vmem:[%s4440_s0 + $0x3e4] ss:$16 sps:$4 sm:$0xff]   ;;  %v3572_v45 = vld [vmem:[%s4440_s0 + $0x68] ss:$16 sps:$4 sm:$0xff]  }
  0x4a   :  { %v1439_v20 = vrot.slane %v3556_v12, %v3777_v37  ;;  %v1360_v21 = vrot.slane %v3558_v13, %v3777_v37  ;;  %v1432_v25 = vrot.slane %v3560_v18, %v3777_v37  ;;  %v381_v47 = vrot.slane %v3566_v42, %v3777_v37  ;;  %v3575_v49 = vld [vmem:[%s4440_s0 + $0x2c] ss:$16 sps:$4 sm:$0xff]  }
  0x4b   :  { %3205 = vmatpush3.bf16.msra.mxu0 %v3531_v26  ;;  %v1376_v24 = vcombine.high %v1353_v15, %v1367_v16  ;;  %v1446_v26 = vrot.slane %v3561_v19, %v3777_v37  ;;  %v395_v48 = vrot.slane %v3568_v43, %v3777_v37  ;;  %v3576_v50 = vld [vmem:[%s4440_s0 + $0x4c] ss:$16 sps:$4 sm:$0xff]   ;;  %v453_v52 = vrot.slane %v3570_v44, %v3777_v37 }
  0x4c   :  { %3269 = vmatpush3.bf16.msra.mxu1 %v3533_v35  ;;  %3206 = vmatprep.subr.bf16.mxu0 %v3546_v56  ;;  %v1448_v29 = vcombine.high %v1425_v17, %v1439_v20  ;;  %v3577_v51 = vld [vmem:[%s4440_s0 + $0x6c] ss:$16 sps:$4 sm:$0xff]   ;;  %v467_v53 = vrot.slane %v3572_v45, %v3777_v37  ;;  %v388_v54 = vrot.slane %v3574_v46, %v3777_v37 }
  0x4d   :  { %2248 = vmatmul.mubr.bf16.gmra.mrb[12].mxu0 %v1639_v36  ;;  %v1656_v36 = vpack.c.bf16 %v1160_v27, %v1088_v22  ;;  %3270 = vmatprep.subr.bf16.mxu1 %v3548_v1  ;;  %v1374_v22 = vrot.slane %v3559_v14, %v3777_v37  ;;  %v1375_v27 = vcombine.low %v1353_v15, %v1367_v16  ;;  %v3580_v1 = vld [vmem:[%s4440_s0 + $0xa8] ss:$16 sps:$4 sm:$0xff]   ;;  %v3587_v9 = vld [vmem:[%s4440_s0 + $0xac] ss:$16 sps:$4 sm:$0xff]  }
  0x4e   :  { %2345 = vmatmul.mubr.bf16.gmra.mrb[12].mxu1 %v1641_v39  ;;  %2255 = vmatprep.mubr.bf16.mxu0 %v1648_v4  ;;  %v1658_v39 = vpack.c.bf16 %v1162_v32, %v1090_v31  ;;  %v1305_v4 = vcombine.low %v1288_v55, %v1302_v59  ;;  %v1447_v31 = vcombine.low %v1425_v17, %v1439_v20  ;;  %v3588_v10 = vld [vmem:[%s4440_s0 + $0xcc] ss:$16 sps:$4 sm:$0xff]  }
  0x4f   :  { %2352 = vmatprep.mubr.bf16.mxu1 %v1650_v6  ;;  %3207 = vmatpush3.bf16.msra.mxu0 %v3547_v61  ;;  %v1663_v6 = vpack.c.bf16 %v1303_v63, %v1231_v60  ;;  %v1378_v30 = vcombine.high %v1360_v21, %v1374_v22  ;;  %v1377_v32 = vcombine.low %v1360_v21, %v1374_v22  ;;  %v3589_v15 = vld [vmem:[%s4440_s0 + $0xec] ss:$16 sps:$4 sm:$0xff]  }
  0x50   :  { %v1665_v8 = vpack.c.bf16 %v1305_v4, %v1233_v0  ;;  %3208 = vmatprep.subr.bf16.mxu0 %v3562_v23  ;;  %v1450_v34 = vcombine.high %v1432_v25, %v1446_v26  ;;  %v1449_v35 = vcombine.low %v1432_v25, %v1446_v26  ;;  %v403_v55 = vcombine.low %v381_v47, %v395_v48  ;;  %v3601_v42 = vld [vmem:[%s4440_s0 + $0x16c] ss:$16 sps:$4 sm:$0xff]  }
  0x51   :  { %v404_v56 = vcombine.high %v381_v47, %v395_v48  ;;  %v402_v57 = vrot.slane %v3575_v49, %v3777_v37  ;;  %v460_v58 = vrot.slane %v3576_v50, %v3777_v37  ;;  %v475_v59 = vcombine.low %v453_v52, %v467_v53 }
  0x52   :  { %v1673_v41 = vpack.c.bf16 %v1449_v35, %v1377_v32  ;;  %v476_v60 = vcombine.high %v453_v52, %v467_v53  ;;  %v474_v61 = vrot.slane %v3577_v51, %v3777_v37  ;;  %v539_v12 = vrot.slane %v3580_v1, %v3777_v37  ;;  %v3598_v35 = vld [vmem:[%s4440_s0 + $0x10c] ss:$16 sps:$4 sm:$0xff]   ;;  %v3602_v53 = vld [vmem:[%s4440_s0 + $0x188] ss:$16 sps:$4 sm:$0xff]  }
  0x53   :  { %3209 = vmatpush3.bf16.msra.mxu0 %v3563_v28  ;;  %v405_v63 = vcombine.low %v388_v54, %v402_v57  ;;  %v406_v0 = vcombine.high %v388_v54, %v402_v57  ;;  %v546_v19 = vrot.slane %v3587_v9, %v3777_v37  ;;  %v604_v22 = vrot.slane %v3588_v10, %v3777_v37  ;;  %v3592_v28 = vld [vmem:[%s4440_s0 + $0x128] ss:$16 sps:$4 sm:$0xff]  }
  0x54   :  { %v1620_v4 = vpack.c.bf16 %v476_v60, %v404_v56  ;;  %v618_v23 = vrot.slane %v3589_v15, %v3777_v37  ;;  %v676_v46 = vrot.slane %v3598_v35, %v3777_v37  ;;  %v762_v50 = vrot.slane %v3601_v42, %v3777_v37  ;;  %v3604_v54 = vld [vmem:[%s4440_s0 + $0x1a8] ss:$16 sps:$4 sm:$0xff]  }
  0x55   :  { %2256 = vmatmul.mubr.bf16.gmra.mrb[16].mxu0 %v1647_v5  ;;  %v3549_v5 = vld [vmem:[#allocation4 + $0x1b0] sm:$0xff]   ;;  %v3608_v60 = vld [vmem:[%s4440_s0 + $0x1e8] ss:$16 sps:$4 sm:$0xff]   ;;  %v827_v1 = vrot.slane %v3604_v54, %v3777_v37 }
  0x56   :  { %2353 = vmatmul.mubr.bf16.gmra.mrb[16].mxu1 %v1649_v7  ;;  %2263 = vmatprep.mubr.bf16.mxu0 %v1656_v36  ;;  %v1666_v7 = vpack.c.bf16 %v1306_v3, %v1234_v62  ;;  %v3565_v36 = vld [vmem:[#allocation4 + $0x1b8] sm:$0xff]  }
  0x57   :  { %2360 = vmatprep.mubr.bf16.mxu1 %v1658_v39  ;;  %3271 = vmatpush3.bf16.msra.mxu1 %v3549_v5  ;;  %v1671_v39 = vpack.c.bf16 %v1447_v31, %v1375_v27  ;;  %v3578_v62 = vld [vmem:[%s4440_s0 + $0x88] ss:$16 sps:$4 sm:$0xff]   ;;  %v477_v5 = vcombine.low %v460_v58, %v474_v61  ;;  %v622_v31 = vcombine.high %v604_v22, %v618_v23 }
  0x58   :  { %3272 = vmatprep.subr.bf16.mxu1 %v3564_v33  ;;  %v3584_v3 = vld [vmem:[%s4440_s0 + $0xe8] ss:$16 sps:$4 sm:$0xff]   ;;  %v525_v11 = vrot.slane %v3578_v62, %v3777_v37  ;;  %v621_v33 = vcombine.low %v604_v22, %v618_v23 }
  0x59   :  { %v611_v14 = vrot.slane %v3584_v3, %v3777_v37  ;;  %v1621_v17 = vpack.c.bf16 %v477_v5, %v405_v63  ;;  %v3590_v27 = vld [vmem:[%s4440_s0 + $0x108] ss:$16 sps:$4 sm:$0xff]   ;;  %v3612_v3 = vld [vmem:[%s4440_s0 + $0x1cc] ss:$16 sps:$4 sm:$0xff]  }
  0x5a   :  { %v548_v20 = vcombine.high %v525_v11, %v539_v12  ;;  %v547_v25 = vcombine.low %v525_v11, %v539_v12  ;;  %v3614_v15 = vld [vmem:[%s4440_s0 + $0x208] ss:$16 sps:$4 sm:$0xff]  }
  0x5b   :  { %3273 = vmatpush3.bf16.msra.mxu1 %v3565_v36  ;;  %v3599_v36 = vld [vmem:[%s4440_s0 + $0x12c] ss:$16 sps:$4 sm:$0xff]   ;;  %v3626_v42 = vld [vmem:[%s4440_s0 + $0x288] ss:$16 sps:$4 sm:$0xff]  }
  0x5c   :  { %v690_v48 = vrot.slane %v3599_v36, %v3777_v37 }
  0x5d   :  { %2264 = vmatmul.mubr.bf16.gmra.mrb[20].mxu0 %v1655_v38  ;;  %v1672_v38 = vpack.c.bf16 %v1448_v29, %v1376_v24  ;;  %v3594_v29 = vld [vmem:[%s4440_s0 + $0x148] ss:$16 sps:$4 sm:$0xff]  }
  0x5e   :  { %2361 = vmatmul.mubr.bf16.gmra.mrb[20].mxu1 %v1657_v40  ;;  %2271 = vmatprep.mubr.bf16.mxu0 %v1664_v2  ;;  %v1674_v40 = vpack.c.bf16 %v1450_v34, %v1378_v30  ;;  %v3582_v2 = vld [vmem:[%s4440_s0 + $0xc8] ss:$16 sps:$4 sm:$0xff]   ;;  %v693_v63 = vcombine.low %v676_v46, %v690_v48 }
  0x5f   :  { %2368 = vmatprep.mubr.bf16.mxu1 %v1666_v7  ;;  %v1619_v7 = vpack.c.bf16 %v475_v59, %v403_v55  ;;  %v597_v13 = vrot.slane %v3582_v2, %v3777_v37  ;;  %v3596_v34 = vld [vmem:[%s4440_s0 + $0x168] ss:$16 sps:$4 sm:$0xff]   ;;  %v694_v55 = vcombine.high %v676_v46, %v690_v48  ;;  %v3611_v2 = vld [vmem:[%s4440_s0 + $0x1ac] ss:$16 sps:$4 sm:$0xff]  }
  0x60   :  { %v755_v45 = vrot.slane %v3596_v34, %v3777_v37  ;;  %v3606_v59 = vld [vmem:[%s4440_s0 + $0x1c8] ss:$16 sps:$4 sm:$0xff]   ;;  %v834_v11 = vrot.slane %v3611_v2, %v3777_v37 }
  0x61   :  { %v620_v21 = vcombine.high %v597_v13, %v611_v14  ;;  %v619_v26 = vcombine.low %v597_v13, %v611_v14  ;;  %v892_v13 = vrot.slane %v3612_v3, %v3777_v37 }
  0x63   :  { %v1628_v30 = vpack.c.bf16 %v620_v21, %v548_v20  ;;  %v1627_v44 = vpack.c.bf16 %v619_v26, %v547_v25  ;;  %v3620_v20 = vld [vmem:[%s4440_s0 + $0x268] ss:$16 sps:$4 sm:$0xff]   ;;  %v3622_v25 = vld [vmem:[%s4440_s0 + $0x20c] ss:$16 sps:$4 sm:$0xff]  }
  0x64   :  { %v3623_v26 = vld [vmem:[%s4440_s0 + $0x22c] ss:$16 sps:$4 sm:$0xff]   ;;  %v964_v35 = vrot.slane %v3622_v25, %v3777_v37 }
  0x65   :  { %2272 = vmatmul.mubr.bf16.gmra.mrb[24].mxu0 %v1663_v6  ;;  %v478_v6 = vcombine.high %v460_v58, %v474_v61  ;;  %v3610_v61 = vld [vmem:[%s4440_s0 + $0x18c] ss:$16 sps:$4 sm:$0xff]   ;;  %v978_v36 = vrot.slane %v3623_v26, %v3777_v37 }
  0x66   :  { %2369 = vmatmul.mubr.bf16.gmra.mrb[24].mxu1 %v1665_v8  ;;  %2279 = vmatprep.mubr.bf16.mxu0 %v1672_v38  ;;  %v3586_v8 = vld [vmem:[%s4440_s0 + $0x8c] ss:$16 sps:$4 sm:$0xff]   ;;  %v669_v38 = vrot.slane %v3590_v27, %v3777_v37  ;;  %v820_v10 = vrot.slane %v3610_v61, %v3777_v37 }
  0x67   :  { %2376 = vmatprep.mubr.bf16.mxu1 %v1674_v40  ;;  %v1622_v16 = vpack.c.bf16 %v478_v6, %v406_v0  ;;  %v532_v18 = vrot.slane %v3586_v8, %v3777_v37  ;;  %v741_v40 = vrot.slane %v3594_v29, %v3777_v37  ;;  %v813_v0 = vrot.slane %v3602_v53, %v3777_v37  ;;  %v3624_v27 = vld [vmem:[%s4440_s0 + $0x24c] ss:$16 sps:$4 sm:$0xff]  }
  0x68   :  { %v899_v8 = vrot.slane %v3608_v60, %v3777_v37  ;;  %v3637_v53 = vld [vmem:[%s4440_s0 + $0x2ec] ss:$16 sps:$4 sm:$0xff]  }
  0x69   :  { %v550_v24 = vcombine.high %v532_v18, %v546_v19  ;;  %v549_v32 = vcombine.low %v532_v18, %v546_v19  ;;  %v764_v52 = vcombine.high %v741_v40, %v755_v45  ;;  %v763_v58 = vcombine.low %v741_v40, %v755_v45  ;;  %v3616_v18 = vld [vmem:[%s4440_s0 + $0x228] ss:$16 sps:$4 sm:$0xff]  }
  0x6a   :  { %v836_v9 = vcombine.high %v813_v0, %v827_v1  ;;  %v3618_v19 = vld [vmem:[%s4440_s0 + $0x248] ss:$16 sps:$4 sm:$0xff]   ;;  %v971_v29 = vrot.slane %v3616_v18, %v3777_v37  ;;  %v1036_v40 = vrot.slane %v3624_v27, %v3777_v37  ;;  %v837_v45 = vcombine.low %v820_v10, %v834_v11 }
  0x6b   :  { %v1630_v43 = vpack.c.bf16 %v622_v31, %v550_v24  ;;  %v1629_v51 = vpack.c.bf16 %v621_v33, %v549_v32  ;;  %v4176_v24 = vrot.slane %v3614_v15, %v3777_v37  ;;  %v1043_v31 = vrot.slane %v3620_v20, %v3777_v37  ;;  %v3625_v32 = vld [vmem:[%s4440_s0 + $0x26c] ss:$16 sps:$4 sm:$0xff]  }
  0x6d   :  { %2280 = vmatmul.mubr.bf16.gmra.mrb[28].mxu0 %v1671_v39  ;;  %v683_v39 = vrot.slane %v3592_v28, %v3777_v37  ;;  %v835_v28 = vcombine.low %v813_v0, %v827_v1  ;;  %v3638_v0 = vld [vmem:[%s4440_s0 + $0x308] ss:$16 sps:$4 sm:$0xff]  }
  0x6e   :  { %2377 = vmatmul.mubr.bf16.gmra.mrb[28].mxu1 %v1673_v41  ;;  %2417 = vmatprep.mubr.bf16.mxu0 %v1620_v4  ;;  %v3600_v41 = vld [vmem:[%s4440_s0 + $0x14c] ss:$16 sps:$4 sm:$0xff]  }
  0x6f   :  { %2514 = vmatprep.mubr.bf16.mxu1 %v1622_v16  ;;  %v692_v47 = vcombine.high %v669_v38, %v683_v39  ;;  %v748_v49 = vrot.slane %v3600_v41, %v3777_v37  ;;  %v691_v57 = vcombine.low %v669_v38, %v683_v39  ;;  %v3613_v4 = vld [vmem:[%s4440_s0 + $0x1ec] ss:$16 sps:$4 sm:$0xff]   ;;  %v980_v38 = vcombine.high %v4176_v24, %v971_v29 }
  0x70   :  { %v906_v14 = vrot.slane %v3613_v4, %v3777_v37  ;;  %v1050_v41 = vrot.slane %v3625_v32, %v3777_v37  ;;  %v1194_v4 = vrot.slane %v3637_v53, %v3777_v37  ;;  %v3654_v32 = vld [vmem:[%s4440_s0 + $0x3c8] ss:$16 sps:$4 sm:$0xff]  }
  0x71   :  { %v766_v56 = vcombine.high %v748_v49, %v762_v50  ;;  %v1636_v62 = vpack.c.bf16 %v764_v52, %v692_v47  ;;  %v765_v6 = vcombine.low %v748_v49, %v762_v50  ;;  %v1635_v16 = vpack.c.bf16 %v763_v58, %v691_v57  ;;  %v3632_v49 = vld [vmem:[%s4440_s0 + $0x2e8] ss:$16 sps:$4 sm:$0xff]   ;;  %v3634_v50 = vld [vmem:[%s4440_s0 + $0x28c] ss:$16 sps:$4 sm:$0xff]  }
  0x72   :  { %v910_v23 = vcombine.high %v892_v13, %v906_v14  ;;  %v909_v46 = vcombine.low %v892_v13, %v906_v14  ;;  %v982_v47 = vcombine.high %v964_v35, %v978_v36  ;;  %v1054_v48 = vcombine.high %v1036_v40, %v1050_v41  ;;  %v3636_v52 = vld [vmem:[%s4440_s0 + $0x2cc] ss:$16 sps:$4 sm:$0xff]  }
  0x73   :  { %v1638_v5 = vpack.c.bf16 %v766_v56, %v694_v55  ;;  %v1637_v21 = vpack.c.bf16 %v765_v6, %v693_v63  ;;  %v4223_v56 = vrot.slane %v3626_v42, %v3777_v37  ;;  %v1108_v1 = vrot.slane %v3634_v50, %v3777_v37  ;;  %v3642_v6 = vld [vmem:[%s4440_s0 + $0x348] ss:$16 sps:$4 sm:$0xff]  }
  0x74   :  { %v1645_v60 = vpack.c.bf16 %v909_v46, %v837_v45  ;;  %v1654_v61 = vpack.c.bf16 %v1054_v48, %v982_v47  ;;  %v1180_v3 = vrot.slane %v3636_v52, %v3777_v37  ;;  %v1053_v13 = vcombine.low %v1036_v40, %v1050_v41  ;;  %v3659_v40 = vld [vmem:[%s4440_s0 + $0x3ac] ss:$16 sps:$4 sm:$0xff]  }
  0x75   :  { %2418 = vmatmul.mubr.bf16.vlgmr.msra.gmra.mrb[32].mxu0 %v1619_v7  ;;  %v885_v7 = vrot.slane %v3606_v59, %v3777_v37  ;;  %v1187_v59 = vrot.slane %v3632_v49, %v3777_v37  ;;  %v3660_v41 = vld [vmem:[%s4440_s0 + $0x3cc] ss:$16 sps:$4 sm:$0xff]  }
  0x76   :  { %2515 = vmatmul.mubr.bf16.vlgmr.msra.gmra.mrb[32].mxu1 %v1621_v17  ;;  %2425 = vmatprep.mubr.bf16.mxu0 %v1628_v30  ;;  %v838_v17 = vcombine.high %v820_v10, %v834_v11  ;;  %v1029_v30 = vrot.slane %v3618_v19, %v3777_v37  ;;  %v3648_v10 = vld [vmem:[%s4440_s0 + $0x34c] ss:$16 sps:$4 sm:$0xff]   ;;  %v1198_v18 = vcombine.high %v1180_v3, %v1194_v4 }
  0x77   :  { %2522 = vmatprep.mubr.bf16.mxu1 %v1630_v43  ;;  %v908_v12 = vcombine.high %v885_v7, %v899_v8  ;;  %v907_v34 = vcombine.low %v885_v7, %v899_v8  ;;  %v3628_v43 = vld [vmem:[%s4440_s0 + $0x2a8] ss:$16 sps:$4 sm:$0xff]   ;;  %v3646_v8 = vld [vmem:[%s4440_s0 + $0x30c] ss:$16 sps:$4 sm:$0xff]   ;;  %v1245_v19 = vrot.slane %v3638_v0, %v3777_v37  ;;  %v1324_v27 = vrot.slane %v3648_v10, %v3777_v37 }
  0x78   :  { %v1646_v33 = vpack.c.bf16 %v910_v23, %v838_v17  ;;  %v1052_v39 = vcombine.high %v1029_v30, %v1043_v31  ;;  %v1115_v57 = vrot.slane %v3628_v43, %v3777_v37  ;;  %v1051_v63 = vcombine.low %v1029_v30, %v1043_v31  ;;  %v3644_v7 = vld [vmem:[%s4440_s0 + $0x368] ss:$16 sps:$4 sm:$0xff]   ;;  %v3649_v11 = vld [vmem:[%s4440_s0 + $0x36c] ss:$16 sps:$4 sm:$0xff]  }
  0x79   :  { %v1644_v22 = vpack.c.bf16 %v908_v12, %v836_v9  ;;  %v1643_v54 = vpack.c.bf16 %v907_v34, %v835_v28  ;;  %v3647_v9 = vld [vmem:[%s4440_s0 + $0x32c] ss:$16 sps:$4 sm:$0xff]   ;;  %v981_v12 = vcombine.low %v964_v35, %v978_v36  ;;  %v1252_v25 = vrot.slane %v3646_v8, %v3777_v37  ;;  %v3650_v30 = vld [vmem:[%s4440_s0 + $0x388] ss:$16 sps:$4 sm:$0xff]  }
  0x7a   :  { %v1652_v55 = vpack.c.bf16 %v1052_v39, %v980_v38  ;;  %v1124_v14 = vcombine.high %v4223_v56, %v1115_v57  ;;  %v1266_v26 = vrot.slane %v3647_v9, %v3777_v37  ;;  %v1338_v28 = vrot.slane %v3649_v11, %v3777_v37  ;;  %v3652_v31 = vld [vmem:[%s4440_s0 + $0x3a8] ss:$16 sps:$4 sm:$0xff]   ;;  %v3658_v39 = vld [vmem:[%s4440_s0 + $0x38c] ss:$16 sps:$4 sm:$0xff]  }
  0x7b   :  { %v1653_v23 = vpack.c.bf16 %v1053_v13, %v981_v12  ;;  %v1123_v34 = vcombine.low %v4223_v56, %v1115_v57  ;;  %v1197_v43 = vcombine.low %v1180_v3, %v1194_v4  ;;  %v3661_v46 = vld [vmem:[%s4440_s0 + $0x3ec] ss:$16 sps:$4 sm:$0xff]   ;;  %v1389_v49 = vrot.slane %v3650_v30, %v3777_v37 }
  0x7c   :  { %v1342_v45 = vcombine.high %v1324_v27, %v1338_v28  ;;  %v1403_v50 = vrot.slane %v3652_v31, %v3777_v37  ;;  %v1410_v56 = vrot.slane %v3659_v40, %v3777_v37  ;;  %v1468_v57 = vrot.slane %v3660_v41, %v3777_v37  ;;  %v3663_v11 = vld [vmem:[%s4443_s3 + $0x8] sm:$0xff]  }
  0x7d   :  { %2426 = vmatmul.mubr.bf16.gmra.mrb[36].mxu0 %v1627_v44  ;;  %v3630_v44 = vld [vmem:[%s4440_s0 + $0x2c8] ss:$16 sps:$4 sm:$0xff]   ;;  %v1341_v0 = vcombine.low %v1324_v27, %v1338_v28 }
  0x7e   :  { %2523 = vmatmul.mubr.bf16.gmra.mrb[36].mxu1 %v1629_v51  ;;  %2433 = vmatprep.mubr.bf16.mxu0 %v1636_v62  ;;  %v3635_v51 = vld [vmem:[%s4440_s0 + $0x2ac] ss:$16 sps:$4 sm:$0xff]   ;;  %v1173_v58 = vrot.slane %v3630_v44, %v3777_v37  ;;  %v979_v62 = vcombine.low %v4176_v24, %v971_v29  ;;  %v1270_v44 = vcombine.high %v1252_v25, %v1266_v26 }
  0x7f   :  { %2530 = vmatprep.mubr.bf16.mxu1 %v1638_v5  ;;  %v1122_v2 = vrot.slane %v3635_v51, %v3777_v37  ;;  %v3640_v5 = vld [vmem:[%s4440_s0 + $0x328] ss:$16 sps:$4 sm:$0xff]   ;;  %v1461_v51 = vrot.slane %v3654_v32, %v3777_v37 }
  0x80   :  { %v1196_v15 = vcombine.high %v1173_v58, %v1187_v59  ;;  %v1259_v20 = vrot.slane %v3640_v5, %v3777_v37  ;;  %v1195_v35 = vcombine.low %v1173_v58, %v1187_v59  ;;  %v1482_v58 = vrot.slane %v3661_v46, %v3777_v37 }
  0x81   :  { %v1126_v17 = vcombine.high %v1108_v1, %v1122_v2  ;;  %v1125_v42 = vcombine.low %v1108_v1, %v1122_v2  ;;  %v3662_v1 = vld [vmem:[%s4443_s3] sm:$0xff]  }
  0x82   :  { %v1660_v24 = vpack.c.bf16 %v1196_v15, %v1124_v14  ;;  %v1268_v36 = vcombine.high %v1245_v19, %v1259_v20  ;;  %v1659_v47 = vpack.c.bf16 %v1195_v35, %v1123_v34  ;;  %v1267_v59 = vcombine.low %v1245_v19, %v1259_v20  ;;  %3347 = vmatprep.subr.bf16.mxu0 %v3662_v1  ;;  %v3664_v14 = vld [vmem:[%s4443_s3 + $0x10] sm:$0xff]   ;;  %v3665_v15 = vld [vmem:[%s4443_s3 + $0x18] sm:$0xff]  }
  0x83   :  { %v1662_v29 = vpack.c.bf16 %v1198_v18, %v1126_v17  ;;  %v1661_v53 = vpack.c.bf16 %v1197_v43, %v1125_v42  ;;  %v1486_v3 = vcombine.high %v1468_v57, %v1482_v58  ;;  %3348 = vmatpush3.bf16.msra.mxu0 %v3662_v1  ;;  %v1485_v10 = vcombine.low %v1468_v57, %v1482_v58  ;;  %v3667_v17 = vld [vmem:[%s4443_s3 + $0x28] sm:$0xff]   ;;  %v3668_v18 = vld [vmem:[%s4443_s3 + $0x30] sm:$0xff]   ;;  %v3669_v19 = vld [vmem:[%s4443_s3 + $0x38] sm:$0xff]  }
  0x84   :  { %3349 = vmatprep.subr.bf16.mxu0 %v3663_v11 }
  0x85   :  { %2434 = vmatmul.mubr.bf16.gmra.mrb[40].mxu0 %v1635_v16  ;;  %v1651_v16 = vpack.c.bf16 %v1051_v63, %v979_v62  ;;  %v1269_v63 = vcombine.low %v1252_v25, %v1266_v26 }
  0x86   :  { %2441 = vmatprep.mubr.bf16.mxu0 %v1644_v22  ;;  %2531 = vmatmul.mubr.bf16.gmra.mrb[40].mxu1 %v1637_v21  ;;  %v1317_v21 = vrot.slane %v3642_v6, %v3777_v37  ;;  %v1331_v22 = vrot.slane %v3644_v7, %v3777_v37  ;;  %v1411_v7 = vcombine.low %v1389_v49, %v1403_v50 }
  0x87   :  { %2538 = vmatprep.mubr.bf16.mxu1 %v1646_v33  ;;  %v3656_v33 = vld [vmem:[%s4440_s0 + $0x3e8] ss:$16 sps:$4 sm:$0xff]   ;;  %3350 = vmatpush3.bf16.msra.mxu0 %v3663_v11 }
  0x88   :  { %v1340_v38 = vcombine.high %v1317_v21, %v1331_v22  ;;  %v1475_v52 = vrot.slane %v3656_v33, %v3777_v37  ;;  %3351 = vmatprep.subr.bf16.mxu0 %v3664_v14 }
  0x8a   :  { %v1668_v48 = vpack.c.bf16 %v1340_v38, %v1268_v36  ;;  %v1484_v62 = vcombine.high %v1461_v51, %v1475_v52  ;;  %v1483_v8 = vcombine.low %v1461_v51, %v1475_v52 }
  0x8b   :  { %3352 = vmatpush3.bf16.msra.mxu0 %v3664_v14 }
  0x8c   :  { %v1675_v12 = vpack.c.bf16 %v1483_v8, %v1411_v7  ;;  %3353 = vmatprep.subr.bf16.mxu0 %v3665_v15 }
  0x8d   :  { %2442 = vmatmul.mubr.bf16.gmra.mrb[44].mxu0 %v1643_v54  ;;  %v1670_v54 = vpack.c.bf16 %v1342_v45, %v1270_v44 }
  0x8e   :  { %2449 = vmatprep.mubr.bf16.mxu0 %v1652_v55  ;;  %2539 = vmatmul.mubr.bf16.gmra.mrb[44].mxu1 %v1645_v60  ;;  %v1396_v55 = vrot.slane %v3658_v39, %v3777_v37  ;;  %v1339_v60 = vcombine.low %v1317_v21, %v1331_v22  ;;  %v1669_v37 = vpack.c.bf16 %v1341_v0, %v1269_v63 }
  0x8f   :  { %2546 = vmatprep.mubr.bf16.mxu1 %v1654_v61  ;;  %v1412_v61 = vcombine.high %v1389_v49, %v1403_v50  ;;  %3354 = vmatpush3.bf16.msra.mxu0 %v3665_v15 }
  0x90   :  { %v1414_v2 = vcombine.high %v1396_v55, %v1410_v56  ;;  %v1667_v4 = vpack.c.bf16 %v1339_v60, %v1267_v59  ;;  %v1413_v9 = vcombine.low %v1396_v55, %v1410_v56 }
  0x91   :  { %v1676_v5 = vpack.c.bf16 %v1484_v62, %v1412_v61 }
  0x92   :  { %v1678_v6 = vpack.c.bf16 %v1486_v3, %v1414_v2  ;;  %v1677_v13 = vpack.c.bf16 %v1485_v10, %v1413_v9 }
  0x95   :  { %2450 = vmatmul.mubr.bf16.gmra.mrb[48].mxu0 %v1651_v16  ;;  %v3666_v16 = vld [vmem:[%s4443_s3 + $0x20] sm:$0xff]  }
  0x96   :  { %2457 = vmatprep.mubr.bf16.mxu0 %v1660_v24  ;;  %2547 = vmatmul.mubr.bf16.gmra.mrb[48].mxu1 %v1653_v23 }
  0x97   :  { %2554 = vmatprep.mubr.bf16.mxu1 %v1662_v29  ;;  %3355 = vmatprep.subr.bf16.mxu0 %v3666_v16 }
  0x98   :  { %3356 = vmatpush3.bf16.msra.mxu0 %v3666_v16 }
  0x99   :  { %3357 = vmatprep.subr.bf16.mxu0 %v3667_v17 }
  0x9c   :  { %3358 = vmatpush3.bf16.msra.mxu0 %v3667_v17 }
  0x9d   :  { %2458 = vmatmul.mubr.bf16.gmra.mrb[52].mxu0 %v1659_v47  ;;  %3359 = vmatprep.subr.bf16.mxu0 %v3668_v18 }
  0x9e   :  { %2465 = vmatprep.mubr.bf16.mxu0 %v1668_v48  ;;  %2555 = vmatmul.mubr.bf16.gmra.mrb[52].mxu1 %v1661_v53 }
  0x9f   :  { %2562 = vmatprep.mubr.bf16.mxu1 %v1670_v54 }
  0xa0   :  { %3360 = vmatpush3.bf16.msra.mxu0 %v3668_v18 }
  0xa1   :  { %3361 = vmatprep.subr.bf16.mxu0 %v3669_v19 }
  0xa4   :  { %3362 = vmatpush3.bf16.msra.mxu0 %v3669_v19 }
  0xa5   :  { %2466 = vmatmul.mubr.bf16.gmra.mrb[56].mxu0 %v1667_v4 }
  0xa6   :  { %2473 = vmatprep.mubr.bf16.mxu0 %v1676_v5  ;;  %2563 = vmatmul.mubr.bf16.gmra.mrb[56].mxu1 %v1669_v37 }
  0xa7   :  { %2570 = vmatprep.mubr.bf16.mxu1 %v1678_v6 }
  0xad   :  { %2474 = vmatmul.mubr.bf16.gmra.mrb[60].mxu0 %v1675_v12 }
  0xae   :  { %2571 = vmatmul.mubr.bf16.gmra.mrb[60].mxu1 %v1677_v13 }
 0x108   :  { %v3082_v20 = vpop.f32.mrb[0].mxu0 }
 0x109   :  { %v3083_v21 = vpop.f32.mrb[1].mxu0  ;;  %v3146_v22 = vpop.f32.mrb[0].mxu1 }
 0x10a   :  { %v3084_v23 = vadd.f32 %v3083_v21, %v3082_v20  ;;  %v3085_v24 = vpop.f32.mrb[2].mxu0  ;;  %v3147_v25 = vpop.f32.mrb[1].mxu1 }
 0x10b   :  { %v3086_v26 = vpop.f32.mrb[3].mxu0  ;;  %v3148_v27 = vadd.f32 %v3147_v25, %v3146_v22  ;;  %v3149_v28 = vpop.f32.mrb[2].mxu1 }
 0x10c   :  { %v3087_v29 = vadd.f32 %v3086_v26, %v3085_v24  ;;  %v3150_v30 = vpop.f32.mrb[3].mxu1 }
 0x10d   :  { %v4323_v31 = vadd.f32 %v3148_v27, %v3084_v23  ;;  %v3151_v32 = vadd.f32 %v3150_v30, %v3149_v28 }
 0x10f   :  { %v4325_v33 = vadd.f32 %v3151_v32, %v3087_v29 }
 0x110   :  { %v3088_v34 = vpop.f32.mrb[4].mxu0 }
 0x111   :  { %v3152_v35 = vpop.f32.mrb[4].mxu1  ;;  %v3089_v36 = vpop.f32.mrb[5].mxu0 }
 0x112   :  { %v3090_v38 = vadd.f32 %v3089_v36, %v3088_v34  ;;  %v3153_v39 = vpop.f32.mrb[5].mxu1  ;;  %v3091_v40 = vpop.f32.mrb[6].mxu0 }
 0x113   :  { %v3154_v41 = vadd.f32 %v3153_v39, %v3152_v35  ;;  %v3155_v42 = vpop.f32.mrb[6].mxu1  ;;  %v3092_v43 = vpop.f32.mrb[7].mxu0 }
 0x114   :  { %v3093_v44 = vadd.f32 %v3092_v43, %v3091_v40  ;;  %v3156_v45 = vpop.f32.mrb[7].mxu1 }
 0x115   :  { %v4327_v46 = vadd.f32 %v3154_v41, %v3090_v38  ;;  %v3157_v47 = vadd.f32 %v3156_v45, %v3155_v42 }
 0x117   :  { %v4329_v48 = vadd.f32 %v3157_v47, %v3093_v44 }
 0x118   :  { %v3094_v49 = vpop.f32.mrb[8].mxu0 }
 0x119   :  { %v3158_v50 = vpop.f32.mrb[8].mxu1  ;;  %v3095_v51 = vpop.f32.mrb[9].mxu0 }
 0x11a   :  { %v3096_v52 = vadd.f32 %v3095_v51, %v3094_v49  ;;  %v3159_v53 = vpop.f32.mrb[9].mxu1  ;;  %v3097_v54 = vpop.f32.mrb[10].mxu0 }
 0x11b   :  { %v3160_v55 = vadd.f32 %v3159_v53, %v3158_v50  ;;  %v3161_v56 = vpop.f32.mrb[10].mxu1  ;;  %v3098_v57 = vpop.f32.mrb[11].mxu0 }
 0x11c   :  { %v3099_v58 = vadd.f32 %v3098_v57, %v3097_v54  ;;  %v3162_v59 = vpop.f32.mrb[11].mxu1 }
 0x11d   :  { %v4331_v60 = vadd.f32 %v3160_v55, %v3096_v52  ;;  %v3163_v61 = vadd.f32 %v3162_v59, %v3161_v56 }
 0x11f   :  { %v4333_v62 = vadd.f32 %v3163_v61, %v3099_v58 }
 0x120   :  { %v3100_v63 = vpop.f32.mrb[12].mxu0 }
 0x121   :  { %v3101_v0 = vpop.f32.mrb[13].mxu0  ;;  %v3164_v1 = vpop.f32.mrb[12].mxu1 }
 0x122   :  { %v3102_v2 = vadd.f32 %v3101_v0, %v3100_v63  ;;  %v3103_v3 = vpop.f32.mrb[14].mxu0  ;;  %v3165_v4 = vpop.f32.mrb[13].mxu1 }
 0x123   :  { %v3104_v5 = vpop.f32.mrb[15].mxu0  ;;  %v3166_v37 = vadd.f32 %v3165_v4, %v3164_v1  ;;  %v3167_v6 = vpop.f32.mrb[14].mxu1 }
 0x124   :  { %v3105_v7 = vadd.f32 %v3104_v5, %v3103_v3  ;;  %v3168_v8 = vpop.f32.mrb[15].mxu1 }
 0x125   :  { %v4335_v9 = vadd.f32 %v3166_v37, %v3102_v2  ;;  %v3169_v10 = vadd.f32 %v3168_v8, %v3167_v6 }
 0x127   :  { %v4337_v11 = vadd.f32 %v3169_v10, %v3105_v7 }
 0x128   :  { %v3106_v12 = vpop.f32.mrb[16].mxu0 }
 0x129   :  { %v3170_v13 = vpop.f32.mrb[16].mxu1  ;;  %v3107_v14 = vpop.f32.mrb[17].mxu0 }
 0x12a   :  { %v3108_v15 = vadd.f32 %v3107_v14, %v3106_v12  ;;  %v3171_v16 = vpop.f32.mrb[17].mxu1  ;;  %v3109_v17 = vpop.f32.mrb[18].mxu0 }
 0x12b   :  { %v3172_v18 = vadd.f32 %v3171_v16, %v3170_v13  ;;  %v3173_v19 = vpop.f32.mrb[18].mxu1  ;;  %v3110_v20 = vpop.f32.mrb[19].mxu0 }
 0x12c   :  { %v3111_v21 = vadd.f32 %v3110_v20, %v3109_v17  ;;  %v3174_v22 = vpop.f32.mrb[19].mxu1 }
 0x12d   :  { %v4339_v23 = vadd.f32 %v3172_v18, %v3108_v15  ;;  %v3175_v24 = vadd.f32 %v3174_v22, %v3173_v19 }
 0x12f   :  { %v4341_v25 = vadd.f32 %v3175_v24, %v3111_v21  ;;  %v4359_v24 = vld [vmem:[%s4442_s2] ss:$0 sm:$0xff] }
 0x130   :  { %v3112_v26 = vpop.f32.mrb[20].mxu0 }
 0x131   :  { %v3176_v27 = vpop.f32.mrb[20].mxu1  ;;  %v3113_v28 = vpop.f32.mrb[21].mxu0 }
 0x132   :  { %v3114_v29 = vadd.f32 %v3113_v28, %v3112_v26  ;;  %v3177_v30 = vpop.f32.mrb[21].mxu1  ;;  %v3115_v32 = vpop.f32.mrb[22].mxu0 }
 0x133   :  { %v3178_v34 = vadd.f32 %v3177_v30, %v3176_v27  ;;  %v3179_v35 = vpop.f32.mrb[22].mxu1  ;;  %v3116_v36 = vpop.f32.mrb[23].mxu0 }
 0x134   :  { %v3117_v38 = vadd.f32 %v3116_v36, %v3115_v32  ;;  %v3180_v39 = vpop.f32.mrb[23].mxu1 }
 0x135   :  { %v4343_v40 = vadd.f32 %v3178_v34, %v3114_v29  ;;  %v3181_v41 = vadd.f32 %v3180_v39, %v3179_v35 }
 0x137   :  { %v4345_v42 = vadd.f32 %v3181_v41, %v3117_v38 }
 0x138   :  { %v3118_v43 = vpop.f32.mrb[24].mxu0 }
 0x139   :  { %v3119_v44 = vpop.f32.mrb[25].mxu0  ;;  %v3182_v45 = vpop.f32.mrb[24].mxu1 }
 0x13a   :  { %v3120_v47 = vadd.f32 %v3119_v44, %v3118_v43  ;;  %v3121_v49 = vpop.f32.mrb[26].mxu0  ;;  %v3183_v50 = vpop.f32.mrb[25].mxu1 }
 0x13b   :  { %v3122_v51 = vpop.f32.mrb[27].mxu0  ;;  %v3184_v52 = vadd.f32 %v3183_v50, %v3182_v45  ;;  %v3185_v53 = vpop.f32.mrb[26].mxu1 }
 0x13c   :  { %v3123_v54 = vadd.f32 %v3122_v51, %v3121_v49  ;;  %v3186_v55 = vpop.f32.mrb[27].mxu1 }
 0x13d   :  { %v4347_v56 = vadd.f32 %v3184_v52, %v3120_v47  ;;  %v3187_v57 = vadd.f32 %v3186_v55, %v3185_v53 }
 0x13f   :  { %v4349_v58 = vadd.f32 %v3187_v57, %v3123_v54 }
 0x140   :  { %v3124_v59 = vpop.f32.mrb[28].mxu0 }
 0x141   :  { %v3188_v61 = vpop.f32.mrb[28].mxu1  ;;  %v3125_v63 = vpop.f32.mrb[29].mxu0 }
 0x142   :  { %v3126_v0 = vadd.f32 %v3125_v63, %v3124_v59  ;;  %v3189_v1 = vpop.f32.mrb[29].mxu1  ;;  %v3127_v2 = vpop.f32.mrb[30].mxu0 }
 0x143   :  { %v3190_v3 = vadd.f32 %v3189_v1, %v3188_v61  ;;  %v3191_v4 = vpop.f32.mrb[30].mxu1  ;;  %v3128_v5 = vpop.f32.mrb[31].mxu0 }
 0x144   :  { %v3129_v37 = vadd.f32 %v3128_v5, %v3127_v2  ;;  %v3192_v6 = vpop.f32.mrb[31].mxu1 }
 0x145   :  { %v4351_v7 = vadd.f32 %v3190_v3, %v3126_v0  ;;  %v3193_v8 = vadd.f32 %v3192_v6, %v3191_v4 }
 0x147   :  { %v4353_v10 = vadd.f32 %v3193_v8, %v3129_v37 }
 0x148   :  { %v3210_v12 = vpop.f32.mrb[32].mxu0 }
 0x149   :  { %v3211_v13 = vpop.f32.mrb[33].mxu0  ;;  %v3274_v14 = vpop.f32.mrb[32].mxu1 }
 0x14a   :  { %v3212_v15 = vadd.f32 %v3211_v13, %v3210_v12  ;;  %v3213_v16 = vpop.f32.mrb[34].mxu0  ;;  %v3275_v17 = vpop.f32.mrb[33].mxu1 }
 0x14b   :  { %v3214_v18 = vpop.f32.mrb[35].mxu0  ;;  %v3276_v20 = vadd.f32 %v3275_v17, %v3274_v14  ;;  %v3277_v21 = vpop.f32.mrb[34].mxu1 }
 0x14c   :  { %v2420_v19 = vadd.f32 %v3212_v15, %v4323_v31  ;;  %v3215_v22 = vadd.f32 %v3214_v18, %v3213_v16  ;;  %v3278_v26 = vpop.f32.mrb[35].mxu1 }
 0x14d   :  { %v3279_v29 = vadd.f32 %v3278_v26, %v3277_v21 }
 0x14e   :  { %v2517_v27 = vadd.f32 %v3276_v20, %v2420_v19  ;;  %v2423_v28 = vadd.f32 %v3215_v22, %v4325_v33 }
 0x150   :  { %v2637_v30 = vadd.f32 %v4359_v24, %v2517_v27  ;;  %v2520_v32 = vadd.f32 %v3279_v29, %v2423_v28  ;;  %v3216_v34 = vpop.f32.mrb[36].mxu0 }
 0x151   :  { %v3217_v35 = vpop.f32.mrb[37].mxu0  ;;  %v3280_v38 = vpop.f32.mrb[36].mxu1 }
 0x152   :  { %v2669_v36 = vmul.f32 0.2, %v2637_v30  ;;  %v2638_v31 = vadd.f32 %v4359_v24, %v2520_v32  ;;  %v3218_v39 = vadd.f32 %v3217_v35, %v3216_v34  ;;  %v3219_v41 = vpop.f32.mrb[38].mxu0  ;;  %vm2653_vm0 = vcmp.gt.f32.partialorder %v2637_v30, 0.0  ;;  %v3281_v43 = vpop.f32.mrb[37].mxu1 }
 0x153   :  { %v3220_v44 = vpop.f32.mrb[39].mxu0  ;;  %v3282_v49 = vadd.f32 %v3281_v43, %v3280_v38  ;;  %v3283_v33 = vpop.f32.mrb[38].mxu1 }
 0x154   :  { %v2670_v45 = vmul.f32 0.2, %v2638_v31  ;;  %v2428_v47 = vadd.f32 %v3218_v39, %v4327_v46  ;;  %v3221_v50 = vadd.f32 %v3220_v44, %v3219_v41  ;;  %v3284_v51 = vpop.f32.mrb[39].mxu1  ;;  %vm2654_vm1 = vcmp.gt.f32.partialorder %v2638_v31, 0.0 }
 0x155   :  { %v2685_v52 = vsel %vm2653_vm0, %v2637_v30, %v2669_v36  ;;  %v3285_v55 = vadd.f32 %v3284_v51, %v3283_v33  ;;  %vm3723_vm0 = vmmov 0  }
 0x156   :  { %v2525_v53 = vadd.f32 %v3282_v49, %v2428_v47  ;;  %v2431_v54 = vadd.f32 %v3221_v50, %v4329_v48  ;;  %v2686_v57 = vsel %vm2654_vm1, %v2638_v31, %v2670_v45 }
 0x157   :  { %v2701_v59 = vpack.c.bf16 %v2686_v57, %v2685_v52 }
 0x158   :  { %v2639_v61 = vadd.f32 %v4359_v24, %v2525_v53  ;;  %v2528_v63 = vadd.f32 %v3285_v55, %v2431_v54  ;;  %v3222_v0 = vpop.f32.mrb[40].mxu0 }
 0x159   :  { %v3223_v1 = vpop.f32.mrb[41].mxu0  ;;  %3363 = vmatprep.mubr.bf16.mxu0 %v2701_v59  ;;  %v3286_v3 = vpop.f32.mrb[40].mxu1 }
 0x15a   :  { %v2671_v2 = vmul.f32 0.2, %v2639_v61  ;;  %v2640_v46 = vadd.f32 %v4359_v24, %v2528_v63  ;;  %v3224_v4 = vadd.f32 %v3223_v1, %v3222_v0  ;;  %v3225_v5 = vpop.f32.mrb[42].mxu0  ;;  %vm2655_vm2 = vcmp.gt.f32.partialorder %v2639_v61, 0.0  ;;  %v3287_v37 = vpop.f32.mrb[41].mxu1 }
 0x15b   :  { %v3226_v6 = vpop.f32.mrb[43].mxu0  ;;  %v3289_v12 = vpop.f32.mrb[42].mxu1  ;;  %v3288_v13 = vadd.f32 %v3287_v37, %v3286_v3 }
 0x15c   :  { %vm2656_vm3 = vcmp.gt.f32.partialorder %v2640_v46, 0.0  ;;  %v2672_v48 = vmul.f32 0.2, %v2640_v46  ;;  %v2436_v8 = vadd.f32 %v3224_v4, %v4331_v60  ;;  %v3227_v14 = vadd.f32 %v3226_v6, %v3225_v5  ;;  %v3290_v15 = vpop.f32.mrb[43].mxu1 }
 0x15d   :  { %v2687_v16 = vsel %vm2655_vm2, %v2639_v61, %v2671_v2  ;;  %v3291_v18 = vadd.f32 %v3290_v15, %v3289_v12 }
 0x15e   :  { %v2688_v17 = vsel %vm2656_vm3, %v2640_v46, %v2672_v48  ;;  %v2533_v20 = vadd.f32 %v3288_v13, %v2436_v8  ;;  %v2439_v21 = vadd.f32 %v3227_v14, %v4333_v62 }
 0x15f   :  { %v2702_v19 = vpack.c.bf16 %v2688_v17, %v2687_v16 }
 0x160   :  { %v3228_v22 = vpop.f32.mrb[44].mxu0  ;;  %v2641_v26 = vadd.f32 %v4359_v24, %v2533_v20  ;;  %v2536_v27 = vadd.f32 %v3291_v18, %v2439_v21 }
 0x161   :  { %v3229_v28 = vpop.f32.mrb[45].mxu0  ;;  %3364 = vmatmul.mubr.bf16.vlgmr.msra.gmra.mrb[64].mxu0 %v2702_v19  ;;  %v3292_v29 = vpop.f32.mrb[44].mxu1 }
 0x162   :  { %v3230_v30 = vadd.f32 %v3229_v28, %v3228_v22  ;;  %v3231_v60 = vpop.f32.mrb[46].mxu0  ;;  %v2673_v32 = vmul.f32 0.2, %v2641_v26  ;;  %v2642_v34 = vadd.f32 %v4359_v24, %v2536_v27  ;;  %v3293_v35 = vpop.f32.mrb[45].mxu1  ;;  %vm2657_vm4 = vcmp.gt.f32.partialorder %v2641_v26, 0.0 }
 0x163   :  { %v3232_v36 = vpop.f32.mrb[47].mxu0  ;;  %v3294_v38 = vadd.f32 %v3293_v35, %v3292_v29  ;;  %v3295_v39 = vpop.f32.mrb[46].mxu1 }
 0x164   :  { %v2444_v31 = vadd.f32 %v3230_v30, %v4335_v9  ;;  %v3233_v41 = vadd.f32 %v3232_v36, %v3231_v60  ;;  %v2674_v62 = vmul.f32 0.2, %v2642_v34  ;;  %v3296_v43 = vpop.f32.mrb[47].mxu1  ;;  %vm2658_vm5 = vcmp.gt.f32.partialorder %v2642_v34, 0.0 }
 0x165   :  { %v3297_v47 = vadd.f32 %v3296_v43, %v3295_v39  ;;  %v2689_v49 = vsel %vm2657_vm4, %v2641_v26, %v2673_v32 }
 0x166   :  { %v2541_v44 = vadd.f32 %v3294_v38, %v2444_v31  ;;  %v2447_v45 = vadd.f32 %v3233_v41, %v4337_v11  ;;  %v2690_v33 = vsel %vm2658_vm5, %v2642_v34, %v2674_v62 }
 0x167   :  { %v2703_v53 = vpack.c.bf16 %v2690_v33, %v2689_v49 }
 0x168   :  { %v2643_v50 = vadd.f32 %v4359_v24, %v2541_v44  ;;  %v2544_v51 = vadd.f32 %v3297_v47, %v2447_v45  ;;  %v3234_v52 = vpop.f32.mrb[48].mxu0 }
 0x169   :  { %v3235_v54 = vpop.f32.mrb[49].mxu0  ;;  %v3298_v57 = vpop.f32.mrb[48].mxu1  ;;  %3367 = vmatprep.mubr.bf16.mxu0 %v2703_v53 }
 0x16a   :  { %v2675_v9 = vmul.f32 0.2, %v2643_v50  ;;  %v2644_v55 = vadd.f32 %v4359_v24, %v2544_v51  ;;  %v3236_v59 = vadd.f32 %v3235_v54, %v3234_v52  ;;  %v3237_v61 = vpop.f32.mrb[50].mxu0  ;;  %vm2659_vm6 = vcmp.gt.f32.partialorder %v2643_v50, 0.0  ;;  %v3299_v63 = vpop.f32.mrb[49].mxu1 }
 0x16b   :  { %v3238_v0 = vpop.f32.mrb[51].mxu0  ;;  %v3300_v2 = vadd.f32 %v3299_v63, %v3298_v57  ;;  %v3301_v46 = vpop.f32.mrb[50].mxu1 }
 0x16c   :  { %v2676_v11 = vmul.f32 0.2, %v2644_v55  ;;  %v2452_v1 = vadd.f32 %v3236_v59, %v4339_v23  ;;  %v3239_v3 = vadd.f32 %v3238_v0, %v3237_v61  ;;  %v3302_v4 = vpop.f32.mrb[51].mxu1  ;;  %vm2660_vm7 = vcmp.gt.f32.partialorder %v2644_v55, 0.0 }
 0x16d   :  { %v2691_v5 = vsel %vm2659_vm6, %v2643_v50, %v2675_v9  ;;  %v3303_v48 = vadd.f32 %v3302_v4, %v3301_v46 }
 0x16e   :  { %v2549_v37 = vadd.f32 %v3300_v2, %v2452_v1  ;;  %v2455_v6 = vadd.f32 %v3239_v3, %v4341_v25  ;;  %v2692_v8 = vsel %vm2660_vm7, %v2644_v55, %v2676_v11 }
 0x16f   :  { %v2704_v12 = vpack.c.bf16 %v2692_v8, %v2691_v5 }
 0x170   :  { %v2645_v13 = vadd.f32 %v4359_v24, %v2549_v37  ;;  %v2552_v14 = vadd.f32 %v3303_v48, %v2455_v6  ;;  %v3240_v15 = vpop.f32.mrb[52].mxu0 }
 0x171   :  { %v3241_v16 = vpop.f32.mrb[53].mxu0  ;;  %3368 = vmatmul.mubr.bf16.gmra.mrb[68].mxu0 %v2704_v12  ;;  %v3304_v18 = vpop.f32.mrb[52].mxu1 }
 0x172   :  { %v2677_v17 = vmul.f32 0.2, %v2645_v13  ;;  %v2646_v23 = vadd.f32 %v4359_v24, %v2552_v14  ;;  %v3242_v19 = vadd.f32 %v3241_v16, %v3240_v15  ;;  %v3243_v20 = vpop.f32.mrb[54].mxu0  ;;  %vm2661_vm8 = vcmp.gt.f32.partialorder %v2645_v13, 0.0  ;;  %v3305_v21 = vpop.f32.mrb[53].mxu1 }
 0x173   :  { %v3244_v22 = vpop.f32.mrb[55].mxu0  ;;  %v3306_v27 = vadd.f32 %v3305_v21, %v3304_v18  ;;  %v3307_v28 = vpop.f32.mrb[54].mxu1 }
 0x174   :  { %v2678_v26 = vmul.f32 0.2, %v2646_v23  ;;  %v2460_v25 = vadd.f32 %v3242_v19, %v4343_v40  ;;  %v3245_v29 = vadd.f32 %v3244_v22, %v3243_v20  ;;  %v3308_v30 = vpop.f32.mrb[55].mxu1  ;;  %vm2662_vm9 = vcmp.gt.f32.partialorder %v2646_v23, 0.0 }
 0x175   :  { %v2693_v60 = vsel %vm2661_vm8, %v2645_v13, %v2677_v17  ;;  %v3309_v35 = vadd.f32 %v3308_v30, %v3307_v28 }
 0x176   :  { %v2557_v32 = vadd.f32 %v3306_v27, %v2460_v25  ;;  %v2463_v34 = vadd.f32 %v3245_v29, %v4345_v42  ;;  %v2694_v36 = vsel %vm2662_vm9, %v2646_v23, %v2678_v26  ;;  %v3722_v29 = vmov 0.0  }
 0x177   :  { %v2705_v31 = vpack.c.bf16 %v2694_v36, %v2693_v60  ;;  %3379 = vmatprep.subr.bf16.mxu1 %v3722_v29  ;;  %3395 = vmatprep.mubr.msk.bf16.mxu1 %vm3723_vm0, %v3722_v29 }
 0x178   :  { %v2647_v38 = vadd.f32 %v4359_v24, %v2557_v32  ;;  %v2560_v39 = vadd.f32 %v3309_v35, %v2463_v34  ;;  %v3246_v41 = vpop.f32.mrb[56].mxu0 }
 0x179   :  { %v3247_v62 = vpop.f32.mrb[57].mxu0  ;;  %3371 = vmatprep.mubr.bf16.mxu0 %v2705_v31  ;;  %v3310_v44 = vpop.f32.mrb[56].mxu1 }
 0x17a   :  { %v2679_v43 = vmul.f32 0.2, %v2647_v38  ;;  %v2648_v40 = vadd.f32 %v4359_v24, %v2560_v39  ;;  %v3248_v45 = vadd.f32 %v3247_v62, %v3246_v41  ;;  %v3249_v47 = vpop.f32.mrb[58].mxu0  ;;  %vm2663_vm10 = vcmp.gt.f32.partialorder %v2647_v38, 0.0  ;;  %v3311_v49 = vpop.f32.mrb[57].mxu1 }
 0x17b   :  { %v3250_v33 = vpop.f32.mrb[59].mxu0  ;;  %v3312_v51 = vadd.f32 %v3311_v49, %v3310_v44  ;;  %v3313_v52 = vpop.f32.mrb[58].mxu1 }
 0x17c   :  { %v2680_v50 = vmul.f32 0.2, %v2648_v40  ;;  %v2468_v42 = vadd.f32 %v3248_v45, %v4347_v56  ;;  %v3251_v53 = vadd.f32 %v3250_v33, %v3249_v47  ;;  %v3314_v54 = vpop.f32.mrb[59].mxu1  ;;  %vm2664_vm11 = vcmp.gt.f32.partialorder %v2648_v40, 0.0 }
 0x17d   :  { %v2695_v9 = vsel %vm2663_vm10, %v2647_v38, %v2679_v43  ;;  %v3315_v59 = vadd.f32 %v3314_v54, %v3313_v52 }
 0x17e   :  { %v2565_v55 = vadd.f32 %v3312_v51, %v2468_v42  ;;  %v2471_v57 = vadd.f32 %v3251_v53, %v4349_v58  ;;  %v2696_v61 = vsel %vm2664_vm11, %v2648_v40, %v2680_v50 }
 0x17f   :  { %v2706_v63 = vpack.c.bf16 %v2696_v61, %v2695_v9 }
 0x180   :  { %v2649_v0 = vadd.f32 %v4359_v24, %v2565_v55  ;;  %v2568_v11 = vadd.f32 %v3315_v59, %v2471_v57  ;;  %v3252_v1 = vpop.f32.mrb[60].mxu0 }
 0x181   :  { %v3253_v2 = vpop.f32.mrb[61].mxu0  ;;  %3372 = vmatmul.mubr.bf16.gmra.mrb[72].mxu0 %v2706_v63  ;;  %v3316_v3 = vpop.f32.mrb[60].mxu1 }
 0x182   :  { %v2681_v46 = vmul.f32 0.2, %v2649_v0  ;;  %v2650_v56 = vadd.f32 %v4359_v24, %v2568_v11  ;;  %v3254_v4 = vadd.f32 %v3253_v2, %v3252_v1  ;;  %v3255_v5 = vpop.f32.mrb[62].mxu0  ;;  %vm2665_vm12 = vcmp.gt.f32.partialorder %v2649_v0, 0.0  ;;  %v3317_v37 = vpop.f32.mrb[61].mxu1 }
 0x183   :  { %v3256_v6 = vpop.f32.mrb[63].mxu0  ;;  %v3318_v8 = vadd.f32 %v3317_v37, %v3316_v3  ;;  %v3319_v12 = vpop.f32.mrb[62].mxu1 }
 0x184   :  { %v2682_v48 = vmul.f32 0.2, %v2650_v56  ;;  %v2476_v58 = vadd.f32 %v3254_v4, %v4351_v7  ;;  %v3257_v13 = vadd.f32 %v3256_v6, %v3255_v5  ;;  %v3320_v14 = vpop.f32.mrb[63].mxu1  ;;  %vm2666_vm13 = vcmp.gt.f32.partialorder %v2650_v56, 0.0 }
 0x185   :  { %v2697_v15 = vsel %vm2665_vm12, %v2649_v0, %v2681_v46  ;;  %v3321_v23 = vadd.f32 %v3320_v14, %v3319_v12 }
 0x186   :  { %v2573_v16 = vadd.f32 %v3318_v8, %v2476_v58  ;;  %v2479_v17 = vadd.f32 %v3257_v13, %v4353_v10  ;;  %v2698_v18 = vsel %vm2666_vm13, %v2650_v56, %v2682_v48  ;;  %v4397_v10 = vld [vmem:[%s4444_s4] ss:$0 sm:$0xff] }
 0x187   :  { %v2707_v19 = vpack.c.bf16 %v2698_v18, %v2697_v15 }
 0x188   :  { %v2651_v20 = vadd.f32 %v4359_v24, %v2573_v16  ;;  %v2576_v21 = vadd.f32 %v3321_v23, %v2479_v17 }
 0x189   :  { %3375 = vmatprep.mubr.bf16.mxu0 %v2707_v19 }
 0x18a   :  { %v2683_v22 = vmul.f32 0.2, %v2651_v20  ;;  %v2652_v26 = vadd.f32 %v4359_v24, %v2576_v21  ;;  %vm2667_vm14 = vcmp.gt.f32.partialorder %v2651_v20, 0.0 }
 0x18c   :  { %v2684_v7 = vmul.f32 0.2, %v2652_v26  ;;  %vm2668_vm15 = vcmp.gt.f32.partialorder %v2652_v26, 0.0  ;;  %v2699_v25 = vsel %vm2667_vm14, %v2651_v20, %v2683_v22 }
 0x18e   :  { %v2700_v27 = vsel %vm2668_vm15, %v2652_v26, %v2684_v7 }
 0x18f   :  { %v2708_v28 = vpack.c.bf16 %v2700_v27, %v2699_v25 }
 0x191   :  { %3376 = vmatmul.mubr.bf16.gmra.mrb[76].mxu0 %v2708_v28 }
 0x234   :  { %v3365_v30 = vpop.f32.mrb[64].mxu0 }
 0x235   :  { %v2823_v24 = vadd.f32 %v3365_v30, %v4397_v10  ;;  %v2814_v60 = vpop.f32.mrb[65].mxu0 }
 0x236   :  { %v2815_v32 = vadd.f32 %v4397_v10, %v2814_v60  ;;  %v3366_v34 = vpop.f32.mrb[66].mxu0 }
 0x237   :  { %v2895_v35 = vmul.f32 0.2, %v2823_v24  ;;  %v2826_v36 = vadd.f32 %v3366_v34, %v4397_v10  ;;  %v2817_v31 = vpop.f32.mrb[67].mxu0  ;;  %vm2879_vm1 = vcmp.gt.f32.partialorder %v2823_v24, 0.0 }
 0x238   :  { %v2893_v38 = vmul.f32 0.2, %v2815_v32  ;;  %v2818_v39 = vadd.f32 %v4397_v10, %v2817_v31  ;;  %vm2877_vm2 = vcmp.gt.f32.partialorder %v2815_v32, 0.0 }
 0x239   :  { %vm2880_vm3 = vcmp.gt.f32.partialorder %v2826_v36, 0.0  ;;  %v2896_v41 = vmul.f32 0.2, %v2826_v36  ;;  %v2911_v43 = vsel %vm2879_vm1, %v2823_v24, %v2895_v35 }
 0x23a   :  { %vm2878_vm4 = vcmp.gt.f32.partialorder %v2818_v39, 0.0  ;;  %v2894_v62 = vmul.f32 0.2, %v2818_v39  ;;  %v2909_v44 = vsel %vm2877_vm2, %v2815_v32, %v2893_v38 }
 0x23b   :  { %v2912_v40 = vsel %vm2880_vm3, %v2826_v36, %v2896_v41  ;;  %v2935_v41 = vstv %s4446_s6 }
 0x23c   :  { %v2926_v45 = vpack.c.bf16 %v2912_v40, %v2911_v43  ;;  %v2910_v47 = vsel %vm2878_vm4, %v2818_v39, %v2894_v62 }
 0x23d   :  { %v2925_v49 = vpack.c.bf16 %v2910_v47, %v2909_v44 }
 0x23f   :  { %3380 = vmatpush3.bf16.xpose.msra.mxu1 %v2925_v49 }
 0x240   :  { %3381 = vmatprep.subr.bf16.mxu1 %v3722_v29 }
 0x244   :  { %v3369_v33 = vpop.f32.mrb[68].mxu0 }
 0x245   :  { %v2839_v50 = vadd.f32 %v3369_v33, %v4397_v10  ;;  %v2830_v42 = vpop.f32.mrb[69].mxu0 }
 0x246   :  { %v2831_v51 = vadd.f32 %v4397_v10, %v2830_v42  ;;  %v3370_v52 = vpop.f32.mrb[70].mxu0 }
 0x247   :  { %v2899_v53 = vmul.f32 0.2, %v2839_v50  ;;  %v2842_v54 = vadd.f32 %v3370_v52, %v4397_v10  ;;  %v2833_v9 = vpop.f32.mrb[71].mxu0  ;;  %3382 = vmatpush3.bf16.xpose.msra.mxu1 %v2926_v45  ;;  %vm2883_vm5 = vcmp.gt.f32.partialorder %v2839_v50, 0.0 }
 0x248   :  { %v2897_v55 = vmul.f32 0.2, %v2831_v51  ;;  %v2834_v57 = vadd.f32 %v4397_v10, %v2833_v9  ;;  %3383 = vmatprep.subr.bf16.mxu1 %v3722_v29  ;;  %vm2881_vm6 = vcmp.gt.f32.partialorder %v2831_v51, 0.0 }
 0x249   :  { %vm2884_vm7 = vcmp.gt.f32.partialorder %v2842_v54, 0.0  ;;  %v2900_v59 = vmul.f32 0.2, %v2842_v54  ;;  %v2915_v63 = vsel %vm2883_vm5, %v2839_v50, %v2899_v53 }
 0x24a   :  { %vm2882_vm8 = vcmp.gt.f32.partialorder %v2834_v57, 0.0  ;;  %v2898_v61 = vmul.f32 0.2, %v2834_v57  ;;  %v2913_v11 = vsel %vm2881_vm6, %v2831_v51, %v2897_v55 }
 0x24b   :  { %v2916_v0 = vsel %vm2884_vm7, %v2842_v54, %v2900_v59 }
 0x24c   :  { %v2928_v1 = vpack.c.bf16 %v2916_v0, %v2915_v63  ;;  %v2914_v2 = vsel %vm2882_vm8, %v2834_v57, %v2898_v61 }
 0x24d   :  { %v2927_v46 = vpack.c.bf16 %v2914_v2, %v2913_v11 }
 0x24f   :  { %3384 = vmatpush3.bf16.xpose.msra.mxu1 %v2927_v46 }
 0x250   :  { %3385 = vmatprep.subr.bf16.mxu1 %v3722_v29 }
 0x254   :  { %v3373_v56 = vpop.f32.mrb[72].mxu0 }
 0x255   :  { %v2855_v3 = vadd.f32 %v3373_v56, %v4397_v10  ;;  %v2846_v4 = vpop.f32.mrb[73].mxu0 }
 0x256   :  { %v2847_v5 = vadd.f32 %v4397_v10, %v2846_v4  ;;  %v3374_v37 = vpop.f32.mrb[74].mxu0 }
 0x257   :  { %v2903_v6 = vmul.f32 0.2, %v2855_v3  ;;  %v2858_v48 = vadd.f32 %v3374_v37, %v4397_v10  ;;  %v2849_v58 = vpop.f32.mrb[75].mxu0  ;;  %3386 = vmatpush3.bf16.xpose.msra.mxu1 %v2928_v1  ;;  %vm2887_vm9 = vcmp.gt.f32.partialorder %v2855_v3, 0.0 }
 0x258   :  { %v2901_v8 = vmul.f32 0.2, %v2847_v5  ;;  %v2850_v12 = vadd.f32 %v4397_v10, %v2849_v58  ;;  %3387 = vmatprep.subr.bf16.mxu1 %v3722_v29  ;;  %vm2885_vm10 = vcmp.gt.f32.partialorder %v2847_v5, 0.0 }
 0x259   :  { %vm2888_vm11 = vcmp.gt.f32.partialorder %v2858_v48, 0.0  ;;  %v2904_v13 = vmul.f32 0.2, %v2858_v48  ;;  %v2919_v15 = vsel %vm2887_vm9, %v2855_v3, %v2903_v6 }
 0x25a   :  { %vm2886_vm12 = vcmp.gt.f32.partialorder %v2850_v12, 0.0  ;;  %v2902_v14 = vmul.f32 0.2, %v2850_v12  ;;  %v2917_v17 = vsel %vm2885_vm10, %v2847_v5, %v2901_v8 }
 0x25b   :  { %v2920_v16 = vsel %vm2888_vm11, %v2858_v48, %v2904_v13 }
 0x25c   :  { %v2930_v23 = vpack.c.bf16 %v2920_v16, %v2919_v15  ;;  %v2918_v18 = vsel %vm2886_vm12, %v2850_v12, %v2902_v14 }
 0x25d   :  { %v2929_v19 = vpack.c.bf16 %v2918_v18, %v2917_v17 }
 0x25f   :  { %3388 = vmatpush3.bf16.xpose.msra.mxu1 %v2929_v19 }
 0x260   :  { %3389 = vmatprep.subr.bf16.mxu1 %v3722_v29 }
 0x264   :  { %v3377_v20 = vpop.f32.mrb[76].mxu0 }
 0x265   :  { %v2871_v21 = vadd.f32 %v3377_v20, %v4397_v10  ;;  %v2862_v22 = vpop.f32.mrb[77].mxu0 }
 0x266   :  { %v2863_v26 = vadd.f32 %v4397_v10, %v2862_v22  ;;  %v3378_v7 = vpop.f32.mrb[78].mxu0 }
 0x267   :  { %v2907_v25 = vmul.f32 0.2, %v2871_v21  ;;  %v2874_v27 = vadd.f32 %v3378_v7, %v4397_v10  ;;  %v2865_v28 = vpop.f32.mrb[79].mxu0  ;;  %3390 = vmatpush3.bf16.xpose.msra.mxu1 %v2930_v23  ;;  %vm2891_vm13 = vcmp.gt.f32.partialorder %v2871_v21, 0.0 }
 0x268   :  { %v2905_v30 = vmul.f32 0.2, %v2863_v26  ;;  %v2866_v24 = vadd.f32 %v4397_v10, %v2865_v28  ;;  %3391 = vmatprep.subr.bf16.mxu1 %v3722_v29  ;;  %vm2889_vm14 = vcmp.gt.f32.partialorder %v2863_v26, 0.0  ;;  %v2933_v10 = vld [vmem:[%s4445_s5] sm:$0x1] }
 0x269   :  { %vm2892_vm15 = vcmp.gt.f32.partialorder %v2874_v27, 0.0  ;;  %v2908_v60 = vmul.f32 0.2, %v2874_v27  ;;  %v2923_v34 = vsel %vm2891_vm13, %v2871_v21, %v2907_v25 }
 0x26a   :  { %vm2890_vm0 = vcmp.gt.f32.partialorder %v2866_v24, 0.0  ;;  %v2906_v32 = vmul.f32 0.2, %v2866_v24  ;;  %v2921_v36 = vsel %vm2889_vm14, %v2863_v26, %v2905_v30 }
 0x26b   :  { %v2924_v35 = vsel %vm2892_vm15, %v2874_v27, %v2908_v60 }
 0x26c   :  { %v2932_v31 = vpack.c.bf16 %v2924_v35, %v2923_v34  ;;  %v2922_v38 = vsel %vm2890_vm0, %v2866_v24, %v2906_v32 }
 0x26d   :  { %v2931_v39 = vpack.c.bf16 %v2922_v38, %v2921_v36 }
 0x26f   :  { %3392 = vmatpush3.bf16.xpose.msra.mxu1 %v2931_v39 }
 0x270   :  { %3393 = vmatprep.subr.bf16.mxu1 %v3722_v29 }
 0x277   :  { %3394 = vmatpush3.bf16.xpose.msra.mxu1 %v2932_v31 }
 0x27e   :  { %3396 = vmatmul.mubr.bf16.vlgmr.msra.gmra.mrb[64].mxu1 %v2933_v10 }
 0x351   :  { %v2970_v62 = vpop.f32.mrb[64].mxu1 }
 0x352   :  { %v2971_v43 = vadd.f32 %v2970_v62, %v2935_v41  ;;  %v3397_v40 = vpop.f32.mrb[65].mxu1 }
 0x353   :  { %v2973_v44 = vpop.f32.mrb[66].mxu1 }
 0x354   :  { %2976 = vst [vmem:[#allocation7] sm:$0x1] %v2971_v43  ;;  %v3398_v45 = vpop.f32.mrb[67].mxu1 }
 0x355   :  { %3703 = shalt.err (!%p3700_p12)
}
 0x356   :  { %s3704_s6 = scalar_lea.hbm %s4447_s7, 16 }
 0x357   :  { %p3705_p13 = scmp.ne.s32.totalorder %s4447_s7, %s3704_s6  ;;  %p3708_p0 = scmp.lt.u32.totalorder %s3704_s6, %s4447_s7 }
 0x359   :  { %p3710_p1 = pnand %p3708_p0, %p3705_p13 }
 0x35b   :  { %3713 = shalt.err (!%p3710_p1)
}
 0x35c   :  { %2986 = dma.vmem_to_hbm [thread:$0]  %s2984_s27, 16, %s4447_s7, [#allocation6]  }
 0x35d   :  { %3716 = dma.done.wait [#allocation6], 16  }
 0x35e   :  { %3717 = vsyncadd [#allocation6], 4294967280 }
 0x35f   :  { %2990 = vsyncpa [#allocation5], 1 }
 0x360   :  { %2991 = vsyncpa [#allocation6], 1 }

</bundles_post_ra>
